<compile_context>
chip_gen: v7x
topology: tpu7x:2x2x1
jax: 0.10.0
libtpu: 0.0.40
codegen_flags: <defaults>
</compile_context>

<pallas_src>
import functools

import numpy as np

import jax
import jax.numpy as jnp
from jax.experimental import pallas as pl
from jax.experimental.pallas import tpu as pltpu


def _lambda_shortcut_kernel(x_ref, s_ref, o_ref, *, bt, cp, cop, padp, precision):
    """One grid step = `bt` images, p channels packed per lane row.

    x_ref : (bt, cp, p*H*W)     inputs (cp = C/p), spatial dims lane-dense
    s_ref : (p*H*W, p*Ho*Wo)    static 0/1 block-diagonal selection matrix
    o_ref : (bt, cop, p*Ho*Wo)  channel-padded, decimated output (cop = C_out/p)
    """
    s = s_ref[...]
    kout = s.shape[-1]

    x = x_ref[...]                                   # (bt, cp, kin)
    xm = x.reshape(bt * cp, x.shape[-1])             # layout-free when cp % 8 == 0
    if xm.dtype != s.dtype:                          # exotic dtypes -> f32 path
        xm = xm.astype(s.dtype)

    # ::2/::2 spatial decimation == one-hot selection matmul on the MXU,
    # fused across the whole batch tile (single dot, M = bt*cp).
    y = jnp.dot(xm, s, precision=precision,
                preferred_element_type=jnp.float32)  # (bt*cp, kout)
    y3 = y.reshape(bt, cp, kout).astype(o_ref.dtype)

    if padp > 0:
        # Zero pad channels: hoisted, two wide sub-slice stores per grid step.
        zeros = jnp.zeros((bt, padp, kout), dtype=o_ref.dtype)
        o_ref[:, 0:padp, :] = zeros
        o_ref[:, padp + cp:cop, :] = zeros
    o_ref[:, padp:padp + cp, :] = y3                 # single data store


def _tensorcores_per_chip():
    """2 on chips whose TensorCores share a chip (v7x and megacore trainers);
    1 on single-TC v5e/v6e.  Fails soft to 1 (only affects tiling preference)."""
    try:
        kind = jax.devices()[0].device_kind.lower().replace(" ", "")
    except Exception:
        return 1
    if any(tag in kind for tag in ("v7", "7x", "v3", "v4", "v5p")):
        return 2
    return 1


def _pick_batch_tile(n, per_image_bytes, *, num_tc, max_bt=64, block_budget=16 << 20):
    """Largest divisor of n such that the double-buffered in+out blocks stay
    under `block_budget`; on multi-TC chips prefer a step count that divides
    evenly across TensorCores (the grid's batch axis is 'parallel')."""
    cap = max(1, block_budget // max(1, 2 * per_image_bytes))
    cap = int(min(cap, max_bt, n))
    divisors = [d for d in range(1, cap + 1) if n % d == 0]
    if num_tc > 1:
        balanced = [d for d in divisors if (n // d) % num_tc == 0]
        if balanced:
            return max(balanced)
    return max(divisors)


def _pick_pack_factor(c, pad, howo):
    """Pack p channels per lane row so output rows reach >=128 lanes (full,
    unmasked vst) whenever the channel / pad counts keep rows cleanly aligned."""
    p = 1
    while (howo * p < 128 and c % (2 * p) == 0
           and (pad == 0 or pad % (2 * p) == 0)):
        p *= 2
    return p


def _build_selection_matrix(h, w, ho, wo, p, dtype):
    """Static 0/1 matrix: (p*H*W, p*Ho*Wo), block-diagonal over the p packed
    channels; column j of each block picks input flat pixel (2i)*W + (2k)."""
    hw, howo = h * w, ho * wo
    base = np.zeros((hw, howo), dtype=np.float32)
    src = (2 * np.arange(ho)[:, None] * w + 2 * np.arange(wo)[None, :]).reshape(-1)
    base[src, np.arange(howo)] = 1.0
    if p == 1:
        sel = base
    else:
        sel = np.zeros((p * hw, p * howo), dtype=np.float32)
        for j in range(p):
            sel[j * hw:(j + 1) * hw, j * howo:(j + 1) * howo] = base
    return jnp.asarray(sel, dtype=dtype)


def lambda_layer(x, planes):
    """Pallas implementation of the LambdaLayer option-A ResNet shortcut."""
    n, c, h, w = x.shape
    pad = planes // 4
    ho, wo = (h + 1) // 2, (w + 1) // 2
    c_out = c + 2 * pad
    hw, howo = h * w, ho * wo

    p = _pick_pack_factor(c, pad, howo)
    cp, cop, padp = c // p, c_out // p, pad // p
    kin, kout = p * hw, p * howo

    if x.dtype == jnp.bfloat16:
        # Single-pass bf16 MXU dot; exact (one nonzero 0/1 product, f32 acc).
        sel_dtype, precision = jnp.bfloat16, None
    else:
        # f32 pass-through stays bit-safe; big-M fusion amortizes the extra passes.
        sel_dtype, precision = jnp.float32, jax.lax.Precision.HIGHEST
    sel = _build_selection_matrix(h, w, ho, wo, p, sel_dtype)

    itemsize = jnp.dtype(x.dtype).itemsize
    per_image_bytes = (c * hw + c_out * howo) * itemsize
    bt = _pick_batch_tile(n, per_image_bytes, num_tc=_tensorcores_per_chip())
    grid = (n // bt,)

    x3 = x.reshape(n, cp, kin)        # row-major flatten + pack, metadata-only

    kernel = functools.partial(_lambda_shortcut_kernel, bt=bt, cp=cp, cop=cop,
                               padp=padp, precision=precision)

    sel_bytes = sel.size * jnp.dtype(sel_dtype).itemsize
    cost = pl.CostEstimate(
        flops=2 * n * cp * kin * kout,
        transcendentals=0,
        bytes_accessed=(n * c * hw + n * c_out * howo) * itemsize + sel_bytes,
    )

    out_flat = pl.pallas_call(
        kernel,
        out_shape=jax.ShapeDtypeStruct((n, cop, kout), x.dtype),
        grid=grid,
        in_specs=[
            pl.BlockSpec((bt, cp, kin), lambda i: (i, 0, 0)),
            pl.BlockSpec((kin, kout), lambda i: (0, 0)),
        ],
        out_specs=pl.BlockSpec((bt, cop, kout), lambda i: (i, 0, 0)),
        compiler_params=pltpu.CompilerParams(
            dimension_semantics=("parallel",),
            vmem_limit_bytes=32 * 1024 * 1024),
        cost_estimate=cost,
    )(x3, sel)

    return out_flat.reshape(n, c_out, ho, wo)   # metadata-only


def _reference(x, planes):
    pad = planes // 4
    y = x[:, :, ::2, ::2]
    return jnp.pad(y, ((0, 0), (pad, pad), (0, 0), (0, 0)))


if __name__ == "__main__":
    key = jax.random.PRNGKey(0)

    # ResNet20 stage-2 -> stage-3 style shortcut (packed path, Ho*Wo = 64 < 128).
    N, C, H, W = 2, 16, 16, 16
    planes = 32                                   # pad = 8 per side -> C_out = 32
    x = jax.random.normal(key, (N, C, H, W), dtype=jnp.float32)
    out = jax.block_until_ready(lambda_layer(x, planes))
    ref = _reference(x, planes)
    assert out.shape == ref.shape, (out.shape, ref.shape)
    assert jnp.allclose(out, ref, rtol=1e-6, atol=1e-6), "f32 packed-path mismatch"

    # Stage-1 -> stage-2 style shortcut (unpacked path, Ho*Wo = 256 lanes), f32.
    x1 = jax.random.normal(jax.random.PRNGKey(1), (2, 16, 32, 32), dtype=jnp.float32)
    out1 = jax.block_until_ready(lambda_layer(x1, 32))
    assert jnp.allclose(out1, _reference(x1, 32), rtol=1e-6, atol=1e-6), \
        "f32 unpacked-path mismatch"

    # bf16 single-pass MXU path (exact by construction for 0/1 selection).
    xb = jax.random.normal(jax.random.PRNGKey(2), (2, 32, 16, 16), dtype=jnp.bfloat16)
    outb = jax.block_until_ready(lambda_layer(xb, 64))
    refb = _reference(xb, 64)
    assert jnp.allclose(outb.astype(jnp.float32), refb.astype(jnp.float32),
                        rtol=1e-6, atol=1e-6), "bf16 path mismatch"

    print("KERNEL_OK")
</pallas_src>

<mosaic_0001>
module attributes {stable_mosaic.version = 11 : i64} {
  func.func @_lambda_shortcut_kernel(%arg0: i32, %arg1: memref<2x8x512xf32, #tpu.memory_space<vmem>>, %arg2: memref<512x128xf32, #tpu.memory_space<vmem>>, %arg3: memref<2x16x128xf32, #tpu.memory_space<vmem>>) attributes {dimension_semantics = [#tpu.dimension_semantics<parallel>], iteration_bounds = array<i64: 1>, scalar_prefetch = 0 : i64, scratch_operands = 0 : i64, tpu.core_type = #tpu.core_type<tc>, window_params = [{transform_indices = @transform_0, window_bounds = array<i64: 2, 8, 512>}, {pipeline_mode = #tpu.pipeline_mode<synchronous>, transform_indices = @transform_1, window_bounds = array<i64: 512, 128>}, {transform_indices = @transform_2, window_bounds = array<i64: 2, 16, 128>}]} {
    %c0 = arith.constant 0 : index
    %c0_0 = arith.constant 0 : index
    %0 = vector.load %arg2[%c0, %c0_0] : memref<512x128xf32, #tpu.memory_space<vmem>>, vector<512x128xf32>
    %c0_1 = arith.constant 0 : index
    %c0_2 = arith.constant 0 : index
    %c0_3 = arith.constant 0 : index
    %1 = vector.load %arg1[%c0_1, %c0_2, %c0_3] : memref<2x8x512xf32, #tpu.memory_space<vmem>>, vector<2x8x512xf32>
    %2 = vector.shape_cast %1 : vector<2x8x512xf32> to vector<16x512xf32>
    %cst = arith.constant dense<0.000000e+00> : vector<16x128xf32>
    %3 = tpu.matmul %2, %0, %cst {dimension_numbers = #tpu.dot_dimension_numbers<[1], [0], [0], [1], [0, 0, 1, 1], [], []>, precision = #tpu.contract_precision<fp32>} : vector<16x512xf32>, vector<512x128xf32>, vector<16x128xf32> -> vector<16x128xf32>
    %4 = vector.shape_cast %3 : vector<16x128xf32> to vector<2x8x128xf32>
    %cst_4 = arith.constant 0.000000e+00 : f32
    %5 = vector.broadcast %cst_4 : f32 to vector<2x4x128xf32>
    %c0_5 = arith.constant 0 : index
    %c0_6 = arith.constant 0 : index
    %c0_7 = arith.constant 0 : index
    %6 = vector.load %arg3[%c0_5, %c0_6, %c0_7] : memref<2x16x128xf32, #tpu.memory_space<vmem>>, vector<2x4x128xf32>
    tpu.vector_store %arg3[%c0_5, %c0_6, %c0_7], %5 {strides = array<i32>} : memref<2x16x128xf32, #tpu.memory_space<vmem>>, vector<2x4x128xf32>,
    %c0_8 = arith.constant 0 : index
    %c12 = arith.constant 12 : index
    %c0_9 = arith.constant 0 : index
    %7 = vector.load %arg3[%c0_8, %c12, %c0_9] : memref<2x16x128xf32, #tpu.memory_space<vmem>>, vector<2x4x128xf32>
    tpu.vector_store %arg3[%c0_8, %c12, %c0_9], %5 {strides = array<i32>} : memref<2x16x128xf32, #tpu.memory_space<vmem>>, vector<2x4x128xf32>,
    %c0_10 = arith.constant 0 : index
    %c4 = arith.constant 4 : index
    %c0_11 = arith.constant 0 : index
    %8 = vector.load %arg3[%c0_10, %c4, %c0_11] : memref<2x16x128xf32, #tpu.memory_space<vmem>>, vector<2x8x128xf32>
    tpu.vector_store %arg3[%c0_10, %c4, %c0_11], %4 {strides = array<i32>} : memref<2x16x128xf32, #tpu.memory_space<vmem>>, vector<2x8x128xf32>,
    return
  }
  func.func @transform_0(%arg0: i32) -> (i32, i32, i32) {
    %c0_i32 = arith.constant 0 : i32
    %c0_i32_0 = arith.constant 0 : i32
    %c0_i32_1 = arith.constant 0 : i32
    return %arg0, %c0_i32, %c0_i32_0 : i32, i32, i32
  }
  func.func @transform_1(%arg0: i32) -> (i32, i32) {
    %c0_i32 = arith.constant 0 : i32
    %c0_i32_0 = arith.constant 0 : i32
    %c0_i32_1 = arith.constant 0 : i32
    return %c0_i32, %c0_i32_0 : i32, i32
  }
  func.func @transform_2(%arg0: i32) -> (i32, i32, i32) {
    %c0_i32 = arith.constant 0 : i32
    %c0_i32_0 = arith.constant 0 : i32
    %c0_i32_1 = arith.constant 0 : i32
    return %arg0, %c0_i32, %c0_i32_0 : i32, i32, i32
  }
}

</mosaic_0001>

<bundles_post_ra>
// kernel: tpu_custom_call.1
= control target key start
LH: loop header
LB: loop body
LE: loop exit
PB: predicated region body
PF: predicated region fallthrough
CT: control target
= control target key end

     0   :  { %7 = vsyncpa [#allocation3], 0  ;;  %s3900_s0 = inlined_call_operand.hbm [shape: f32[2,8,512], index: 0, kind: input, shape index: {}]   ;;  %s3901_s1 = inlined_call_operand.hbm [shape: f32[512,128], index: 1, kind: input, shape index: {}]   ;;  %s3902_s2 = inlined_call_operand.hbm [shape: f32[2,16,128], index: 2, kind: output, shape index: {}]  }
   0x1   :  { %8 = vsyncpa [#allocation6], 0 }
   0x2   :  { %9 = vsyncpa [#allocation4], 0  ;;  %s2892_s9 = smov [#allocation2]   ;;  %s2820_s13 = scalar_lea.hbm %s3900_s0, 1024 }
   0x3   :  { %s15_s10 = sshll.u32 %s2892_s9, 4  ;;  %p2821_p0 = scmp.ne.s32.totalorder %s3900_s0, %s2820_s13  ;;  %s16_s10 = int_to_ptr.vmem [resolvable:$true] %s15_s10 }
   0x4   :  { %p2824_p1 = scmp.lt.u32.totalorder %s2820_s13, %s3900_s0 }
   0x6   :  { %p2826_p2 = pnand %p2824_p1, %p2821_p0 }
   0x8   :  { %2829 = shalt.err (!%p2826_p2)
}
   0x9   :  { %s2830_s18 = scalar_lea.vmem %s16_s10, 1024  ;;  %p2835_p4 = scmp.lt.s32.totalorder %s16_s10, %s16_s10 }
   0xa   :  { %p2831_p3 = scmp.ne.s32.totalorder %s16_s10, %s2830_s18  ;;  %p2836_p5 = scmp.lt.s32.totalorder %s2830_s18, %s2830_s18 }
   0xc   :  { %p2837_p6 = por %p2836_p5, %p2835_p4 }
   0xe   :  { %p2838_p7 = pnand %p2837_p6, %p2831_p3 }
  0x10   :  { %2841 = shalt.err (!%p2838_p7)
}
  0x11   :  { %s2893_s19 = smov 512   ;;  %s2894_s20 = smov 32  }
  0x12   :  { %21 = dma.hbm_to_vmem [thread:$0]  %s3900_s0, 1024, %s16_s10, [#allocation3], %s2893_s19, %s2893_s19, %s2894_s20  }
  0x13   :  { %s2895_s23 = smov [#allocation5]   ;;  %s2842_s27 = scalar_lea.hbm %s3901_s1, 8192 }
  0x14   :  { %s27_s24 = sshll.u32 %s2895_s23, 4  ;;  %p2843_p8 = scmp.ne.s32.totalorder %s3901_s1, %s2842_s27  ;;  %s28_s24 = int_to_ptr.vmem [resolvable:$true] %s27_s24 }
  0x15   :  { %p2846_p9 = scmp.lt.u32.totalorder %s2842_s27, %s3901_s1 }
  0x17   :  { %p2848_p10 = pnand %p2846_p9, %p2843_p8 }
  0x19   :  { %2851 = shalt.err (!%p2848_p10)
}
  0x1a   :  { %s2852_s4 = scalar_lea.vmem %s28_s24, 8192  ;;  %p2857_p12 = scmp.lt.s32.totalorder %s28_s24, %s28_s24 }
  0x1b   :  { %p2853_p11 = scmp.ne.s32.totalorder %s28_s24, %s2852_s4  ;;  %p2858_p13 = scmp.lt.s32.totalorder %s2852_s4, %s2852_s4 }
  0x1d   :  { %p2859_p0 = por %p2858_p13, %p2857_p12 }
  0x1f   :  { %p2860_p1 = pnand %p2859_p0, %p2853_p11 }
  0x21   :  { %2863 = shalt.err (!%p2860_p1)
}
  0x22   :  { %s2896_s0 = smov 128   ;;  %s2897_s5 = smov 8  }
  0x23   :  { %33 = dma.hbm_to_vmem [thread:$0]  %s3901_s1, 8192, %s28_s24, [#allocation6], %s2896_s0, %s2896_s0, %s2897_s5  }
  0x24   :  { %2886 = dma.done.wait [#allocation3], 1024  }
  0x25   :  { %2887 = vsyncadd [#allocation3], 4294966272 }
  0x26   :  { %2888 = dma.done.wait [#allocation6], 8192  }
  0x27   :  { %2889 = vsyncadd [#allocation6], 4294959104  ;;  %v56_v0 = vld [vmem:[#allocation5 + $0x80] sm:$0xff]  ;;  %v57_v1 = vld [vmem:[#allocation5 + $0x88] sm:$0xff]  ;;  %s2899_s1 = smov [#allocation7]  }
  0x28   :  { %v40_v2 = vld [vmem:[#allocation5] sm:$0xff]  ;;  %v161_v3 = vand.u32 4294901760, %v56_v0  ;;  %v164_v4 = vand.u32 4294901760, %v57_v1  ;;  %v41_v5 = vld [vmem:[#allocation5 + $0x8] sm:$0xff]  ;;  %v58_v7 = vld [vmem:[#allocation5 + $0x90] sm:$0xff]  ;;  %s1959_s8 = sshll.u32 %s2899_s1, 4  ;;  %s1960_s8 = int_to_ptr.vmem [resolvable:$true] %s1959_s8 }
  0x29   :  { %v113_v6 = vand.u32 4294901760, %v40_v2  ;;  %v59_v8 = vld [vmem:[#allocation5 + $0x98] sm:$0xff]  ;;  %v116_v9 = vand.u32 4294901760, %v41_v5  ;;  %v167_v10 = vand.u32 4294901760, %v58_v7  ;;  %v42_v12 = vld [vmem:[#allocation5 + $0x10] sm:$0xff]  ;;  %v60_v18 = vld [vmem:[#allocation5 + $0xa0] sm:$0xff]  ;;  %p2869_p3 = scmp.lt.s32.totalorder %s1960_s8, %s1960_s8 }
  0x2a   :  { %v170_v11 = vand.u32 4294901760, %v59_v8  ;;  %v43_v13 = vld [vmem:[#allocation5 + $0x18] sm:$0xff]  ;;  %v2942_v14 = vpack.c.bf16 %v164_v4, %v161_v3  ;;  %v119_v16 = vand.u32 4294901760, %v42_v12  ;;  %v61_v19 = vld [vmem:[#allocation5 + $0xa8] sm:$0xff]  ;;  %v44_v23 = vld [vmem:[#allocation5 + $0x20] sm:$0xff]  ;;  %v173_v29 = vand.u32 4294901760, %v60_v18 }
  0x2b   :  { %v2944_v15 = vsub.f32 %v40_v2, %v113_v6  ;;  %v122_v17 = vand.u32 4294901760, %v43_v13  ;;  %v2946_v20 = vpack.c.bf16 %v116_v9, %v113_v6  ;;  %v2948_v21 = vsub.f32 %v41_v5, %v116_v9  ;;  %v45_v24 = vld [vmem:[#allocation5 + $0x28] sm:$0xff]  ;;  %v62_v37 = vld [vmem:[#allocation5 + $0xb0] sm:$0xff]  ;;  %v63_v42 = vld [vmem:[#allocation5 + $0xb8] sm:$0xff]  ;;  %s2864_s9 = scalar_lea.vmem %s1960_s8, 512 }
  0x2c   :  { %v2950_v22 = vpack.c.bf16 %v170_v11, %v167_v10  ;;  %2429 = vmatprep.subr.bf16.mxu0 %v2942_v14  ;;  %v2953_v25 = vsub.f32 %v58_v7, %v167_v10  ;;  %v2955_v26 = vsub.f32 %v59_v8, %v170_v11  ;;  %v2959_v28 = vsub.f32 %v42_v12, %v119_v16  ;;  %v46_v55 = vld [vmem:[#allocation5 + $0x30] sm:$0xff]  ;;  %v47_v56 = vld [vmem:[#allocation5 + $0x38] sm:$0xff]  ;;  %v64_v5 = vld [vmem:[#allocation5 + $0xc0] sm:$0xff]  ;;  %p2865_p2 = scmp.ne.s32.totalorder %s1960_s8, %s2864_s9  ;;  %p2870_p4 = scmp.lt.s32.totalorder %s2864_s9, %s2864_s9 }
  0x2d   :  { %v2957_v27 = vpack.c.bf16 %v122_v17, %v119_v16  ;;  %2431 = vmatpush3.bf16.msra.mxu0 %v2946_v20  ;;  %v176_v30 = vand.u32 4294901760, %v61_v19  ;;  %v2962_v31 = vsub.f32 %v56_v0, %v161_v3  ;;  %v2964_v32 = vsub.f32 %v57_v1, %v164_v4  ;;  %v65_v6 = vld [vmem:[#allocation5 + $0xc8] sm:$0xff]  ;;  %v48_v11 = vld [vmem:[#allocation5 + $0x40] sm:$0xff] }
  0x2e   :  { %2433 = vmatprep.subr.bf16.mxu0 %v2950_v22  ;;  %v125_v33 = vand.u32 4294901760, %v44_v23  ;;  %v128_v34 = vand.u32 4294901760, %v45_v24  ;;  %v3918_v35 = vand.u32 4294901760, %v2944_v15  ;;  %v3917_v36 = vand.u32 4294901760, %v2948_v21  ;;  %p2871_p5 = por %p2870_p4, %p2869_p3 }
  0x2f   :  { %v2969_v38 = vsub.f32 %v43_v13, %v122_v17  ;;  %v2971_v39 = vpack.c.bf16 %v176_v30, %v173_v29  ;;  %v2973_v40 = vsub.f32 %v60_v18, %v173_v29  ;;  %v3922_v41 = vand.u32 4294901760, %v2962_v31  ;;  %v49_v29 = vld [vmem:[#allocation5 + $0x48] sm:$0xff] }
  0x30   :  { %v2976_v43 = vsub.f32 %v61_v19, %v176_v30  ;;  %v3920_v44 = vand.u32 4294901760, %v2964_v32  ;;  %v2979_v45 = vpack.c.bf16 %v128_v34, %v125_v33  ;;  %v2981_v46 = vsub.f32 %v44_v23, %v125_v33  ;;  %p2872_p6 = pnand %p2871_p5, %p2865_p2 }
  0x31   :  { %2435 = vmatpush3.bf16.msra.mxu0 %v2957_v27  ;;  %v355_v47 = vsub.f32 %v2962_v31, %v3922_v41  ;;  %v243_v48 = vsub.f32 %v2944_v15, %v3918_v35  ;;  %v250_v49 = vsub.f32 %v2948_v21, %v3917_v36  ;;  %v179_v50 = vand.u32 4294901760, %v62_v37  ;;  %v105_v41 = vld [vmem:[#allocation2 + $0x8] sm:$0xff] }
  0x32   :  { %2437 = vmatprep.subr.bf16.mxu0 %v2971_v39  ;;  %v362_v51 = vsub.f32 %v2964_v32, %v3920_v44  ;;  %v182_v52 = vand.u32 4294901760, %v63_v42  ;;  %v3915_v53 = vand.u32 4294901760, %v2953_v25  ;;  %v3913_v54 = vand.u32 4294901760, %v2955_v26 }
  0x33   :  { %v356_v57 = vand.u32 4294901760, %v355_v47  ;;  %v2999_v58 = vsub.f32 %v45_v24, %v128_v34  ;;  %v244_v59 = vand.u32 4294901760, %v243_v48  ;;  %v251_v60 = vand.u32 4294901760, %v250_v49 }
  0x34   :  { %v363_v61 = vand.u32 4294901760, %v362_v51  ;;  %v3001_v62 = vpack.c.bf16 %v182_v52, %v179_v50  ;;  %v3003_v63 = vsub.f32 %v62_v37, %v179_v50  ;;  %v369_v0 = vsub.f32 %v2953_v25, %v3915_v53 }
  0x35   :  { %2439 = vmatpush3.bf16.msra.mxu0 %v2979_v45  ;;  %v2462_v1 = vpack.c.bf16 %v251_v60, %v244_v59  ;;  %v376_v2 = vsub.f32 %v2955_v26, %v3913_v54  ;;  %v131_v3 = vand.u32 4294901760, %v46_v55  ;;  %v134_v4 = vand.u32 4294901760, %v47_v56  ;;  %v67_v59 = vld [vmem:[#allocation5 + $0xd8] sm:$0xff] }
  0x36   :  { %v2460_v7 = vpack.c.bf16 %v363_v61, %v356_v57  ;;  %2441 = vmatprep.subr.bf16.mxu0 %v3001_v62  ;;  %v370_v8 = vand.u32 4294901760, %v369_v0  ;;  %v3912_v9 = vand.u32 4294901760, %v2959_v28  ;;  %v3910_v10 = vand.u32 4294901760, %v2969_v38  ;;  %v66_v57 = vld [vmem:[#allocation5 + $0xd0] sm:$0xff]  ;;  %v71_v54 = vld [vmem:[#allocation5 + $0xf8] sm:$0xff] }
  0x37   :  { %v3015_v12 = vsub.f32 %v63_v42, %v182_v52  ;;  %v377_v13 = vand.u32 4294901760, %v376_v2  ;;  %v3017_v16 = vpack.c.bf16 %v134_v4, %v131_v3  ;;  %v3019_v17 = vsub.f32 %v46_v55, %v131_v3 }
  0x38   :  { %2461 = vmatprep.subr.bf16.mxu1 %v2460_v7  ;;  %v257_v18 = vsub.f32 %v2959_v28, %v3912_v9  ;;  %v264_v19 = vsub.f32 %v2969_v38, %v3910_v10  ;;  %v185_v23 = vand.u32 4294901760, %v64_v5  ;;  %v188_v24 = vand.u32 4294901760, %v65_v6  ;;  %v70_v9 = vld [vmem:[#allocation5 + $0xf0] sm:$0xff] }
  0x39   :  { %2463 = vmatpush3.bf16.msra.mxu1 %v2462_v1  ;;  %v2464_v30 = vpack.c.bf16 %v377_v13, %v370_v8  ;;  %2443 = vmatpush3.bf16.msra.mxu0 %v3017_v16  ;;  %v3908_v33 = vand.u32 4294901760, %v2973_v40  ;;  %v3907_v34 = vand.u32 4294901760, %v2976_v43  ;;  %v137_v37 = vand.u32 4294901760, %v48_v11  ;;  %v50_v1 = vld [vmem:[#allocation5 + $0x50] sm:$0xff] }
  0x3a   :  { %v3030_v42 = vsub.f32 %v47_v56, %v134_v4  ;;  %v258_v47 = vand.u32 4294901760, %v257_v18  ;;  %v265_v48 = vand.u32 4294901760, %v264_v19  ;;  %v3032_v49 = vpack.c.bf16 %v188_v24, %v185_v23  ;;  %v51_v18 = vld [vmem:[#allocation5 + $0x58] sm:$0xff] }
  0x3b   :  { %2465 = vmatprep.subr.bf16.mxu1 %v2464_v30  ;;  %v3034_v50 = vsub.f32 %v64_v5, %v185_v23  ;;  %v383_v51 = vsub.f32 %v2973_v40, %v3908_v33  ;;  %v390_v52 = vsub.f32 %v2976_v43, %v3907_v34  ;;  %v140_v55 = vand.u32 4294901760, %v49_v29 }
  0x3c   :  { %v2466_v56 = vpack.c.bf16 %v265_v48, %v258_v47  ;;  %2445 = vmatprep.subr.bf16.mxu0 %v3032_v49  ;;  %v3043_v60 = vsub.f32 %v65_v6, %v188_v24  ;;  %v3905_v61 = vand.u32 4294901760, %v2981_v46  ;;  %v3903_v0 = vand.u32 4294901760, %v2999_v58 }
  0x3d   :  { %v384_v2 = vand.u32 4294901760, %v383_v51  ;;  %v391_v3 = vand.u32 4294901760, %v390_v52  ;;  %v3047_v4 = vpack.c.bf16 %v140_v55, %v137_v37  ;;  %v3049_v5 = vsub.f32 %v48_v11, %v137_v37 }
  0x3e   :  { %2467 = vmatpush3.bf16.msra.mxu1 %v2466_v56  ;;  %v271_v7 = vsub.f32 %v2981_v46, %v3905_v61  ;;  %v278_v6 = vsub.f32 %v2999_v58, %v3903_v0  ;;  %v191_v8 = vand.u32 4294901760, %v66_v57  ;;  %v194_v13 = vand.u32 4294901760, %v67_v59  ;;  %v69_v0 = vld [vmem:[#allocation5 + $0xe8] sm:$0xff] }
  0x3f   :  { %v2468_v19 = vpack.c.bf16 %v391_v3, %v384_v2  ;;  %2447 = vmatpush3.bf16.msra.mxu0 %v3047_v4  ;;  %v3904_v23 = vand.u32 4294901760, %v3003_v63  ;;  %v3906_v11 = vand.u32 4294901760, %v3015_v12  ;;  %v143_v24 = vand.u32 4294901760, %v50_v1  ;;  %v68_v3 = vld [vmem:[#allocation5 + $0xe0] sm:$0xff] }
  0x40   :  { %v3060_v30 = vsub.f32 %v49_v29, %v140_v55  ;;  %v272_v37 = vand.u32 4294901760, %v271_v7  ;;  %v279_v47 = vand.u32 4294901760, %v278_v6  ;;  %v3062_v48 = vpack.c.bf16 %v194_v13, %v191_v8  ;;  %v52_v6 = vld [vmem:[#allocation5 + $0x60] sm:$0xff] }
  0x41   :  { %2469 = vmatprep.subr.bf16.mxu1 %v2468_v19  ;;  %v3064_v51 = vsub.f32 %v66_v57, %v191_v8  ;;  %v397_v52 = vsub.f32 %v3003_v63, %v3904_v23  ;;  %v404_v56 = vsub.f32 %v3015_v12, %v3906_v11  ;;  %v146_v2 = vand.u32 4294901760, %v51_v18  ;;  %v53_v11 = vld [vmem:[#allocation5 + $0x68] sm:$0xff] }
  0x42   :  { %4004 = vst [vmem:[#allocation11_spill] sm:$0xff] %v3062_v48  ;;  %v2470_v29 = vpack.c.bf16 %v279_v47, %v272_v37  ;;  %2449 = vmatprep.subr.bf16.mxu0 %v3062_v48  ;;  %v3073_v55 = vsub.f32 %v67_v59, %v194_v13  ;;  %v3909_v7 = vand.u32 4294901760, %v3019_v17  ;;  %v3911_v57 = vand.u32 4294901760, %v3030_v42 }
  0x43   :  { %v398_v8 = vand.u32 4294901760, %v397_v52  ;;  %v405_v19 = vand.u32 4294901760, %v404_v56  ;;  %v3077_v23 = vpack.c.bf16 %v146_v2, %v143_v24  ;;  %v3079_v61 = vsub.f32 %v50_v1, %v143_v24 }
  0x44   :  { %2471 = vmatpush3.bf16.msra.mxu1 %v2470_v29  ;;  %v285_v37 = vsub.f32 %v3019_v17, %v3909_v7  ;;  %v292_v59 = vsub.f32 %v3030_v42, %v3911_v57  ;;  %v197_v13 = vand.u32 4294901760, %v68_v3  ;;  %v200_v47 = vand.u32 4294901760, %v69_v0 }
  0x45   :  { %4005 = vst [vmem:[#allocation12_spill] sm:$0xff] %v3077_v23  ;;  %v2472_v34 = vpack.c.bf16 %v405_v19, %v398_v8  ;;  %2451 = vmatpush3.bf16.msra.mxu0 %v3077_v23  ;;  %v3914_v52 = vand.u32 4294901760, %v3034_v50  ;;  %v3916_v1 = vand.u32 4294901760, %v3043_v60  ;;  %v149_v24 = vand.u32 4294901760, %v52_v6  ;;  %v109_v23 = vld [vmem:[#allocation2 + $0x28] sm:$0xff] }
  0x46   :  { %v3090_v56 = vsub.f32 %v51_v18, %v146_v2  ;;  %v286_v29 = vand.u32 4294901760, %v285_v37  ;;  %v293_v33 = vand.u32 4294901760, %v292_v59  ;;  %v3092_v7 = vpack.c.bf16 %v200_v47, %v197_v13  ;;  %v54_v37 = vld [vmem:[#allocation5 + $0x70] sm:$0xff] }
  0x47   :  { %2473 = vmatprep.subr.bf16.mxu1 %v2472_v34  ;;  %v3094_v10 = vsub.f32 %v68_v3, %v197_v13  ;;  %v411_v8 = vsub.f32 %v3034_v50, %v3914_v52  ;;  %v418_v19 = vsub.f32 %v3043_v60, %v3916_v1  ;;  %v152_v57 = vand.u32 4294901760, %v53_v11  ;;  %v55_v1 = vld [vmem:[#allocation5 + $0x78] sm:$0xff] }
  0x48   :  { %4006 = vst [vmem:[#allocation13_spill] sm:$0xff] %v3092_v7  ;;  %v2474_v18 = vpack.c.bf16 %v293_v33, %v286_v29  ;;  %2453 = vmatprep.subr.bf16.mxu0 %v3092_v7  ;;  %v3103_v2 = vsub.f32 %v69_v0, %v200_v47  ;;  %v3919_v34 = vand.u32 4294901760, %v3049_v5  ;;  %v3921_v3 = vand.u32 4294901760, %v3060_v30 }
  0x49   :  { %v412_v59 = vand.u32 4294901760, %v411_v8  ;;  %v419_v13 = vand.u32 4294901760, %v418_v19  ;;  %v3107_v52 = vpack.c.bf16 %v152_v57, %v149_v24  ;;  %v3109_v53 = vsub.f32 %v52_v6, %v149_v24 }
  0x4a   :  { %2475 = vmatpush3.bf16.msra.mxu1 %v2474_v18  ;;  %v299_v33 = vsub.f32 %v3049_v5, %v3919_v34  ;;  %v306_v0 = vsub.f32 %v3060_v30, %v3921_v3  ;;  %v203_v47 = vand.u32 4294901760, %v70_v9  ;;  %v206_v29 = vand.u32 4294901760, %v71_v54 }
  0x4b   :  { %4007 = vst [vmem:[#allocation14_spill] sm:$0xff] %v3107_v52  ;;  %v2476_v36 = vpack.c.bf16 %v419_v13, %v412_v59  ;;  %2455 = vmatpush3.bf16.msra.mxu0 %v3107_v52  ;;  %v3925_v8 = vand.u32 4294901760, %v3064_v51  ;;  %v3926_v6 = vand.u32 4294901760, %v3073_v55  ;;  %v155_v24 = vand.u32 4294901760, %v54_v37 }
  0x4c   :  { %v3120_v19 = vsub.f32 %v53_v11, %v152_v57  ;;  %v300_v18 = vand.u32 4294901760, %v299_v33  ;;  %v307_v35 = vand.u32 4294901760, %v306_v0  ;;  %v3122_v34 = vpack.c.bf16 %v206_v29, %v203_v47 }
  0x4d   :  { %2477 = vmatprep.subr.bf16.mxu1 %v2476_v36  ;;  %v3124_v44 = vsub.f32 %v70_v9, %v203_v47  ;;  %v425_v59 = vsub.f32 %v3064_v51, %v3925_v8  ;;  %v432_v13 = vsub.f32 %v3073_v55, %v3926_v6  ;;  %v158_v3 = vand.u32 4294901760, %v55_v1  ;;  %v104_v9 = vld [vmem:[#allocation2] sm:$0xff] }
  0x4e   :  { %4008 = vst [vmem:[#allocation15_spill] sm:$0xff] %v3122_v34  ;;  %v2478_v52 = vpack.c.bf16 %v307_v35, %v300_v18  ;;  %2457 = vmatprep.subr.bf16.mxu0 %v3122_v34  ;;  %v3133_v11 = vsub.f32 %v71_v54, %v206_v29  ;;  %v3927_v57 = vand.u32 4294901760, %v3079_v61  ;;  %v3928_v36 = vand.u32 4294901760, %v3090_v56 }
  0x4f   :  { %v426_v33 = vand.u32 4294901760, %v425_v59  ;;  %v433_v0 = vand.u32 4294901760, %v432_v13  ;;  %v3137_v47 = vpack.c.bf16 %v158_v3, %v155_v24  ;;  %v3139_v8 = vsub.f32 %v54_v37, %v155_v24 }
  0x50   :  { %2479 = vmatpush3.bf16.msra.mxu1 %v2478_v52  ;;  %v313_v35 = vsub.f32 %v3079_v61, %v3927_v57  ;;  %v320_v54 = vsub.f32 %v3090_v56, %v3928_v36  ;;  %v3147_v29 = vand.u32 4294901760, %v105_v41  ;;  %v3931_v18 = vand.u32 4294901760, %v3094_v10 }
  0x51   :  { %4009 = vst [vmem:[#allocation16_spill] sm:$0xff] %v3137_v47  ;;  %v2480_v6 = vpack.c.bf16 %v433_v0, %v426_v33  ;;  %2459 = vmatpush3.bf16.msra.mxu0 %v3137_v47  ;;  %v3937_v59 = vand.u32 4294901760, %v3103_v2  ;;  %v2492_v52 = vpack.c.bf16 %v2964_v32, %v2962_v31  ;;  %v3154_v37 = vand.u32 4294901760, %v104_v9 }
  0x52   :  { %4010 = vst [vmem:[#allocation17_spill] sm:$0xff] %v3147_v29  ;;  %v314_v24 = vand.u32 4294901760, %v313_v35  ;;  %v321_v13 = vand.u32 4294901760, %v320_v54  ;;  %v3157_v57 = vsub.f32 %v105_v41, %v3147_v29  ;;  %v439_v36 = vsub.f32 %v3094_v10, %v3931_v18  ;;  %464 = vmatprep.mubr.f32.mxu1 %v3147_v29 }
  0x53   :  { %2481 = vmatprep.subr.bf16.mxu1 %v2480_v6  ;;  %v446_v33 = vsub.f32 %v3103_v2, %v3937_v59  ;;  %2493 = vmatprep.subr.bf16.mxu0 %v2492_v52  ;;  %v3167_v0 = vsub.f32 %v104_v9, %v3154_v37  ;;  %v3936_v35 = vand.u32 4294901760, %v3109_v53  ;;  %v3938_v41 = vand.u32 4294901760, %v3120_v19 }
  0x54   :  { %v3171_v54 = vsub.f32 %v55_v1, %v158_v3  ;;  %v2482_v47 = vpack.c.bf16 %v321_v13, %v314_v24  ;;  %v3939_v18 = vand.u32 4294901760, %v3157_v57  ;;  %v440_v34 = vand.u32 4294901760, %v439_v36 }
  0x55   :  { %4011 = vst [vmem:[#allocation18_spill] sm:$0xff] %v3167_v0  ;;  %v447_v29 = vand.u32 4294901760, %v446_v33  ;;  %v3944_v6 = vand.u32 4294901760, %v3167_v0  ;;  %v327_v52 = vsub.f32 %v3109_v53, %v3936_v35  ;;  %v334_v9 = vsub.f32 %v3120_v19, %v3938_v41 }
  0x56   :  { %2483 = vmatpush3.bf16.msra.mxu1 %v2482_v47  ;;  %v211_v1 = vsub.f32 %v3157_v57, %v3939_v18  ;;  %v2494_v3 = vpack.c.bf16 %v2948_v21, %v2944_v15  ;;  %v3945_v36 = vand.u32 4294901760, %v3124_v44  ;;  %v3946_v24 = vand.u32 4294901760, %v3133_v11 }
  0x57   :  { %v2484_v13 = vpack.c.bf16 %v447_v29, %v440_v34  ;;  %v217_v33 = vsub.f32 %v3167_v0, %v3944_v6  ;;  %v328_v35 = vand.u32 4294901760, %v327_v52  ;;  %v335_v59 = vand.u32 4294901760, %v334_v9 }
  0x58   :  { %v212_v41 = vand.u32 4294901760, %v211_v1  ;;  %v453_v47 = vsub.f32 %v3124_v44, %v3945_v36  ;;  %v460_v18 = vsub.f32 %v3133_v11, %v3946_v24  ;;  %v3948_v7 = vand.u32 4294901760, %v3139_v8 }
  0x59   :  { %2485 = vmatprep.subr.bf16.mxu1 %v2484_v13  ;;  %v218_v34 = vand.u32 4294901760, %v217_v33  ;;  %v2486_v29 = vpack.c.bf16 %v335_v59, %v328_v35  ;;  %v2496_v6 = vpack.c.bf16 %v2955_v26, %v2953_v25  ;;  %v3947_v52 = vand.u32 4294901760, %v3171_v54  ;;  %v108_v59 = vld [vmem:[#allocation2 + $0x20] sm:$0xff] }
  0x5a   :  { %213 = vmatprep.mubr.f32.mxu0 %v212_v41  ;;  %v454_v9 = vand.u32 4294901760, %v453_v47  ;;  %v461_v1 = vand.u32 4294901760, %v460_v18  ;;  %v341_v36 = vsub.f32 %v3139_v8, %v3948_v7  ;;  %v3207_v33 = vand.u32 4294901760, %v109_v23 }
  0x5b   :  { %219 = vmatmul.mubr.f32.vlgmr.msra.gmra.mrb[0].mxu0 %v218_v34  ;;  %2487 = vmatpush3.bf16.msra.mxu1 %v2486_v29  ;;  %v348_v13 = vsub.f32 %v3171_v54, %v3947_v52  ;;  %v2498_v41 = vpack.c.bf16 %v2969_v38, %v2959_v28  ;;  %v2500_v47 = vpack.c.bf16 %v2976_v43, %v2973_v40  ;;  %v3216_v29 = vand.u32 4294901760, %v108_v59 }
  0x5c   :  { %2495 = vmatpush3.bf16.msra.mxu0 %v2494_v3  ;;  %v2488_v35 = vpack.c.bf16 %v461_v1, %v454_v9  ;;  %v342_v24 = vand.u32 4294901760, %v341_v36  ;;  %v3214_v34 = vsub.f32 %v109_v23, %v3207_v33  ;;  %v2502_v3 = vpack.c.bf16 %v2999_v58, %v2981_v46 }
  0x5d   :  { %2497 = vmatprep.subr.bf16.mxu0 %v2496_v6  ;;  %v349_v18 = vand.u32 4294901760, %v348_v13  ;;  %v2504_v36 = vpack.c.bf16 %v3015_v12, %v3003_v63  ;;  %v4012_v9 = vand.u32 4294901760, %v2962_v31  ;;  %v4013_v6 = vand.u32 4294901760, %v2964_v32 }
  0x5e   :  { %2489 = vmatprep.subr.bf16.mxu1 %v2488_v35  ;;  %v225_v13 = vand.u32 4294901760, %v3214_v34  ;;  %v3228_v23 = vsub.f32 %v108_v59, %v3216_v29  ;;  %v4014_v35 = vand.u32 4294901760, %v2944_v15  ;;  %v4016_v7 = vand.u32 4294901760, %v2953_v25 }
  0x5f   :  { %v2490_v52 = vpack.c.bf16 %v349_v18, %v342_v24  ;;  %v2556_v1 = vpack.c.bf16 %v4013_v6, %v4012_v9  ;;  %v4015_v24 = vand.u32 4294901760, %v2948_v21  ;;  %v4017_v0 = vand.u32 4294901760, %v2955_v26 }
  0x60   :  { %2499 = vmatpush3.bf16.msra.mxu0 %v2498_v41  ;;  %v4018_v31 = vand.u32 4294901760, %v2959_v28  ;;  %v4019_v32 = vand.u32 4294901760, %v2969_v38  ;;  %v4020_v59 = vand.u32 4294901760, %v2973_v40  ;;  %v4021_v15 = vand.u32 4294901760, %v2976_v43 }
  0x61   :  { %v2558_v18 = vpack.c.bf16 %v4015_v24, %v4014_v35  ;;  %v3238_v48 = vpack.c.bf16 %v4017_v0, %v4016_v7  ;;  %2491 = vmatpush3.bf16.msra.mxu1 %v2490_v52  ;;  %2501 = vmatprep.subr.bf16.mxu0 %v2500_v47  ;;  %v4022_v25 = vand.u32 4294901760, %v2981_v46  ;;  %v4023_v26 = vand.u32 4294901760, %v2999_v58 }
  0x62   :  { %v3244_v41 = vpack.c.bf16 %v4019_v32, %v4018_v31  ;;  %v3250_v21 = vpack.c.bf16 %v4021_v15, %v4020_v59  ;;  %2525 = vmatprep.subr.bf16.mxu1 %v2942_v14  ;;  %v226_v28 = vsub.f32 %v3214_v34, %v225_v13  ;;  %v231_v38 = vand.u32 4294901760, %v3228_v23 }
  0x63   :  { %v3256_v7 = vpack.c.bf16 %v4023_v26, %v4022_v25  ;;  %v4024_v40 = vand.u32 4294901760, %v3003_v63  ;;  %v4025_v43 = vand.u32 4294901760, %v3015_v12  ;;  %v4026_v46 = vand.u32 4294901760, %v3019_v17  ;;  %v4034_v25 = vld [vmem:[#allocation12_spill] sm:$0xff]  ;;  %v88_v26 = vld [vmem:[#allocation5 + $0x180] sm:$0xff] }
  0x64   :  { %v4027_v58 = vand.u32 4294901760, %v3030_v42  ;;  %v4028_v47 = vand.u32 4294901760, %v3034_v50  ;;  %v4029_v9 = vand.u32 4294901760, %v3043_v60  ;;  %v4030_v35 = vand.u32 4294901760, %v3049_v5  ;;  %466 = vmatmul.mubr.f32.vlgmr.msra.gmra.mrb[0].mxu1 %v3154_v37  ;;  %2503 = vmatpush3.bf16.msra.mxu0 %v2502_v3 }
  0x65   :  { %v3267_v0 = vpack.c.bf16 %v4025_v43, %v4024_v40  ;;  %v4031_v63 = vand.u32 4294901760, %v3060_v30  ;;  %v2506_v12 = vpack.c.bf16 %v3030_v42, %v3019_v17  ;;  %v227_v31 = vand.u32 4294901760, %v226_v28  ;;  %2527 = vmatpush3.bf16.msra.mxu1 %v2946_v20  ;;  %2505 = vmatprep.subr.bf16.mxu0 %v2504_v36  ;;  %v4033_v36 = vld [vmem:[#allocation11_spill] sm:$0xff]  ;;  %v89_v28 = vld [vmem:[#allocation5 + $0x188] sm:$0xff]  ;;  %v4035_v40 = vld [vmem:[#allocation13_spill] sm:$0xff] }
  0x66   :  { %v3273_v52 = vpack.c.bf16 %v4027_v58, %v4026_v46  ;;  %v3279_v6 = vpack.c.bf16 %v4029_v9, %v4028_v47  ;;  %v232_v32 = vsub.f32 %v3228_v23, %v231_v38  ;;  %v2508_v59 = vpack.c.bf16 %v3043_v60, %v3034_v50  ;;  %2529 = vmatprep.subr.bf16.mxu1 %v2950_v22  ;;  %v4036_v43 = vld [vmem:[#allocation18_spill] sm:$0xff]  ;;  %v72_v46 = vld [vmem:[#allocation5 + $0x100] sm:$0xff]  ;;  %v73_v58 = vld [vmem:[#allocation5 + $0x108] sm:$0xff] }
  0x67   :  { %v3285_v24 = vpack.c.bf16 %v4031_v63, %v4030_v35  ;;  %228 = vmatprep.mubr.f32.mxu0 %v227_v31  ;;  %471 = vmatprep.mubr.f32.mxu1 %v3207_v33  ;;  %v2510_v17 = vpack.c.bf16 %v3060_v30, %v3049_v5  ;;  %v2512_v42 = vpack.c.bf16 %v3073_v55, %v3064_v51  ;;  %v4032_v50 = vand.u32 4294901760, %v3157_v57  ;;  %v4037_v35 = vld [vmem:[#allocation14_spill] sm:$0xff]  ;;  %v4038_v63 = vld [vmem:[#allocation15_spill] sm:$0xff]  ;;  %v4039_v31 = vld [vmem:[#allocation17_spill] sm:$0xff] }
  0x68   :  { %v233_v15 = vand.u32 4294901760, %v232_v32  ;;  %2507 = vmatpush3.bf16.msra.mxu0 %v2506_v12  ;;  %473 = vmatmul.mubr.f32.gmra.mrb[2].mxu1 %v3216_v29  ;;  %v2514_v60 = vpack.c.bf16 %v3090_v56, %v3079_v61  ;;  %v2516_v5 = vpack.c.bf16 %v3103_v2, %v3094_v10  ;;  %v2518_v30 = vpack.c.bf16 %v3120_v19, %v3109_v53 }
  0x69   :  { %2531 = vmatpush3.bf16.msra.mxu1 %v2957_v27  ;;  %2509 = vmatprep.subr.bf16.mxu0 %v2508_v59  ;;  %v2522_v3 = vpack.c.bf16 %v3171_v54, %v3139_v8  ;;  %v1079_v47 = vand.u32 4294901760, %v88_v26  ;;  %v1082_v9 = vand.u32 4294901760, %v89_v28  ;;  %v1034_v12 = vand.u32 4294901760, %v73_v58  ;;  %v90_v59 = vld [vmem:[#allocation5 + $0x190] sm:$0xff] }
  0x6a   :  { %2533 = vmatprep.subr.bf16.mxu1 %v2971_v39  ;;  %234 = vmatmul.mubr.f32.gmra.mrb[2].mxu0 %v233_v15  ;;  %v91_v15 = vld [vmem:[#allocation5 + $0x198] sm:$0xff] }
  0x6b   :  { %608 = vmatprep.mubr.f32.mxu0 %v3157_v57  ;;  %724 = vmatprep.mubr.f32.mxu1 %v4032_v50  ;;  %v2520_v57 = vpack.c.bf16 %v3133_v11, %v3124_v44  ;;  %v3334_v32 = vsub.f32 %v88_v26, %v1079_v47  ;;  %v74_v50 = vld [vmem:[#allocation5 + $0x110] sm:$0xff]  ;;  %v4043_v26 = vand.u32 4294901760, %v4036_v43 }
  0x6c   :  { %2511 = vmatpush3.bf16.msra.mxu0 %v2510_v17  ;;  %v4040_v17 = vld [vmem:[#allocation16_spill] sm:$0xff] }
  0x6d   :  { %2535 = vmatpush3.bf16.msra.mxu1 %v2979_v45  ;;  %2513 = vmatprep.subr.bf16.mxu0 %v2512_v42  ;;  %v3343_v42 = vsub.f32 %v73_v58, %v1034_v12 }
  0x6e   :  { %2537 = vmatprep.subr.bf16.mxu1 %v3001_v62 }
  0x70   :  { %2515 = vmatpush3.bf16.msra.mxu0 %v2514_v60  ;;  %v4041_v60 = vand.u32 4294901760, %v3064_v51  ;;  %v4047_v51 = vand.u32 4294901760, %v3103_v2  ;;  %v4051_v2 = vand.u32 4294901760, %v3133_v11  ;;  %v3953_v11 = vand.u32 4294901760, %v3343_v42 }
  0x71   :  { %2539 = vmatpush3.bf16.msra.mxu1 %v3017_v16  ;;  %2517 = vmatprep.subr.bf16.mxu0 %v2516_v5  ;;  %v4042_v5 = vand.u32 4294901760, %v3073_v55  ;;  %v92_v55 = vld [vmem:[#allocation5 + $0x1a0] sm:$0xff] }
  0x72   :  { %2541 = vmatprep.subr.bf16.mxu1 %v3032_v49 }
  0x74   :  { %2519 = vmatpush3.bf16.msra.mxu0 %v2518_v30  ;;  %v2576_v30 = vpack.c.bf16 %v4042_v5, %v4041_v60  ;;  %v3963_v60 = vand.u32 4294901760, %v3334_v32 }
  0x75   :  { %2543 = vmatpush3.bf16.msra.mxu1 %v3047_v4  ;;  %2521 = vmatprep.subr.bf16.mxu0 %v2520_v57  ;;  %v1085_v57 = vand.u32 4294901760, %v90_v59 }
  0x76   :  { %2545 = vmatprep.subr.bf16.mxu1 %v4033_v36 }
  0x78   :  { %2523 = vmatpush3.bf16.msra.mxu0 %v2522_v3  ;;  %v1088_v3 = vand.u32 4294901760, %v91_v15 }
  0x79   :  { %2547 = vmatpush3.bf16.msra.mxu1 %v4034_v25  ;;  %2557 = vmatprep.subr.bf16.mxu0 %v2556_v1  ;;  %v1031_v1 = vand.u32 4294901760, %v72_v46 }
  0x7a   :  { %2549 = vmatprep.subr.bf16.mxu1 %v4035_v40 }
  0x7b   :  { %611 = vmatmul.mubr.f32.vlgmr.msra.gmra.mrb[4].mxu0 %v4036_v43 }
  0x7c   :  { %2559 = vmatpush3.bf16.msra.mxu0 %v2558_v18  ;;  %617 = vmatprep.mubr.f32.mxu0 %v3214_v34  ;;  %v3336_v18 = vsub.f32 %v89_v28, %v1082_v9  ;;  %v3389_v34 = vpack.c.bf16 %v1082_v9, %v1079_v47  ;;  %v1273_v47 = vsub.f32 %v3334_v32, %v3963_v60 }
  0x7d   :  { %2551 = vmatpush3.bf16.msra.mxu1 %v4037_v35  ;;  %2561 = vmatprep.subr.bf16.mxu0 %v3238_v48  ;;  %v3341_v48 = vsub.f32 %v72_v46, %v1031_v1  ;;  %v4046_v46 = vand.u32 4294901760, %v3094_v10  ;;  %v4050_v10 = vand.u32 4294901760, %v3124_v44 }
  0x7e   :  { %2553 = vmatprep.subr.bf16.mxu1 %v4038_v63  ;;  %v3959_v43 = vand.u32 4294901760, %v3336_v18  ;;  %4054 = vst [vmem:[#allocation11_spill] sm:$0xff] %v3389_v34 }
  0x7f   :  { %620 = vmatmul.mubr.f32.gmra.mrb[6].mxu0 %v3228_v23  ;;  %v3362_v58 = vpack.c.bf16 %v4047_v51, %v4046_v46  ;;  %v3379_v5 = vpack.c.bf16 %v4051_v2, %v4050_v10  ;;  %v3954_v44 = vand.u32 4294901760, %v3341_v48  ;;  %v3395_v46 = vsub.f32 %v90_v59, %v1085_v57 }
  0x80   :  { %2563 = vmatpush3.bf16.msra.mxu0 %v3244_v41  ;;  %905 = vmatprep.mubr.f32.mxu0 %v4039_v31  ;;  %v75_v41 = vld [vmem:[#allocation5 + $0x118] sm:$0xff]  ;;  %v3397_v51 = vsub.f32 %v91_v15, %v1088_v3  ;;  %v1280_v9 = vsub.f32 %v3336_v18, %v3959_v43 }
  0x81   :  { %2555 = vmatpush3.bf16.msra.mxu1 %v4040_v17  ;;  %2565 = vmatprep.subr.bf16.mxu0 %v3250_v21  ;;  %v4045_v21 = vand.u32 4294901760, %v3090_v56  ;;  %v4049_v56 = vand.u32 4294901760, %v3120_v19 }
  0x82   :  { %2589 = vmatprep.subr.bf16.mxu1 %v2942_v14  ;;  %v4044_v14 = vand.u32 4294901760, %v3079_v61  ;;  %v4048_v61 = vand.u32 4294901760, %v3109_v53  ;;  %v4053_v53 = vand.u32 4294901760, %v3171_v54  ;;  %v1281_v10 = vand.u32 4294901760, %v1280_v9 }
  0x84   :  { %728 = vmatmul.mubr.f32.vlgmr.msra.gmra.mrb[4].mxu1 %v4043_v26  ;;  %2567 = vmatpush3.bf16.msra.mxu0 %v3256_v7  ;;  %v3356_v28 = vpack.c.bf16 %v4045_v21, %v4044_v14  ;;  %v3373_v7 = vpack.c.bf16 %v4049_v56, %v4048_v61  ;;  %v1037_v26 = vand.u32 4294901760, %v74_v50  ;;  %v1040_v14 = vand.u32 4294901760, %v75_v41  ;;  %v93_v21 = vld [vmem:[#allocation5 + $0x1a8] sm:$0xff] }
  0x85   :  { %2591 = vmatpush3.bf16.msra.mxu1 %v2946_v20  ;;  %735 = vmatprep.mubr.f32.mxu1 %v225_v13  ;;  %v4052_v20 = vand.u32 4294901760, %v3139_v8  ;;  %v3393_v13 = vpack.c.bf16 %v1034_v12, %v1031_v1  ;;  %v77_v61 = vld [vmem:[#allocation5 + $0x128] sm:$0xff]  ;;  %v3402_v8 = vpack.c.bf16 %v1088_v3, %v1085_v57  ;;  %v1094_v54 = vand.u32 4294901760, %v93_v21  ;;  %v94_v1 = vld [vmem:[#allocation5 + $0x1b0] sm:$0xff]  ;;  %v107_v12 = vld [vmem:[#allocation2 + $0x18] sm:$0xff] }
  0x86   :  { %2569 = vmatprep.subr.bf16.mxu0 %v3267_v0  ;;  %2593 = vmatprep.subr.bf16.mxu1 %v2950_v22  ;;  %v1091_v0 = vand.u32 4294901760, %v92_v55  ;;  %v76_v22 = vld [vmem:[#allocation5 + $0x120] sm:$0xff]  ;;  %v3412_v23 = vpack.c.bf16 %v1040_v14, %v1037_v26  ;;  %v1046_v15 = vand.u32 4294901760, %v77_v61  ;;  %v1161_v57 = vsub.f32 %v3341_v48, %v3954_v44 }
  0x87   :  { %v3387_v19 = vpack.c.bf16 %v4053_v53, %v4052_v20  ;;  %4055 = vst [vmem:[#allocation12_spill] sm:$0xff] %v3393_v13  ;;  %4056 = vst [vmem:[#allocation13_spill] sm:$0xff] %v3402_v8  ;;  %v1043_v59 = vand.u32 4294901760, %v76_v22  ;;  %v3958_v3 = vand.u32 4294901760, %v3395_v46  ;;  %v1274_v56 = vand.u32 4294901760, %v1273_v47  ;;  %v79_v20 = vld [vmem:[#allocation5 + $0x138] sm:$0xff] }
  0x88   :  { %739 = vmatmul.mubr.f32.gmra.mrb[6].mxu1 %v231_v38  ;;  %2571 = vmatpush3.bf16.msra.mxu0 %v3273_v52  ;;  %v3414_v38 = vsub.f32 %v74_v50, %v1037_v26  ;;  %v3416_v52 = vsub.f32 %v75_v41, %v1040_v14  ;;  %v3426_v50 = vsub.f32 %v92_v55, %v1091_v0  ;;  %v1097_v41 = vand.u32 4294901760, %v94_v1  ;;  %v78_v14 = vld [vmem:[#allocation5 + $0x130] sm:$0xff] }
  0x89   :  { %2595 = vmatpush3.bf16.msra.mxu1 %v2957_v27  ;;  %2573 = vmatprep.subr.bf16.mxu0 %v3279_v6  ;;  %v1168_v27 = vsub.f32 %v3343_v42, %v3953_v11  ;;  %v95_v6 = vld [vmem:[#allocation5 + $0x1b8] sm:$0xff]  ;;  %v3433_v2 = vand.u32 4294901760, %v107_v12  ;;  %v3436_v26 = vsub.f32 %v93_v21, %v1094_v54  ;;  %v1162_v47 = vand.u32 4294901760, %v1161_v57  ;;  %v97_v57 = vld [vmem:[#allocation5 + $0x1c8] sm:$0xff] }
  0x8a   :  { %2597 = vmatprep.subr.bf16.mxu1 %v2971_v39  ;;  %1016 = vmatprep.mubr.f32.mxu1 %v4039_v31  ;;  %v3955_v39 = vand.u32 4294901760, %v3397_v51  ;;  %v3431_v31 = vpack.c.bf16 %v1094_v54, %v1091_v0  ;;  %v1100_v55 = vand.u32 4294901760, %v95_v6  ;;  %v3956_v53 = vand.u32 4294901760, %v3414_v38 }
  0x8b   :  { %4057 = vst [vmem:[#allocation18_spill] sm:$0xff] %v3433_v2  ;;  %v3957_v11 = vand.u32 4294901760, %v3416_v52  ;;  %v3443_v0 = vsub.f32 %v76_v22, %v1043_v59  ;;  %v1169_v9 = vand.u32 4294901760, %v1168_v27  ;;  %v3445_v44 = vsub.f32 %v77_v61, %v1046_v15 }
  0x8c   :  { %2575 = vmatpush3.bf16.msra.mxu0 %v3285_v24  ;;  %v3441_v24 = vpack.c.bf16 %v1046_v15, %v1043_v59  ;;  %v1294_v21 = vsub.f32 %v3397_v51, %v3955_v39  ;;  %v1049_v22 = vand.u32 4294901760, %v78_v14  ;;  %v1052_v54 = vand.u32 4294901760, %v79_v20  ;;  %v96_v59 = vld [vmem:[#allocation5 + $0x1c0] sm:$0xff] }
  0x8d   :  { %2599 = vmatpush3.bf16.msra.mxu1 %v2979_v45  ;;  %2577 = vmatprep.subr.bf16.mxu0 %v2576_v30  ;;  %v3447_v45 = vsub.f32 %v94_v1, %v1097_v41  ;;  %v1287_v30 = vsub.f32 %v3395_v46, %v3958_v3  ;;  %v3459_v61 = vsub.f32 %v107_v12, %v3433_v2  ;;  %v3478_v39 = vld [vmem:[#allocation5 + $0x140] sm:$0xff] }
  0x8e   :  { %2601 = vmatprep.subr.bf16.mxu1 %v3001_v62  ;;  %4058 = vst [vmem:[#allocation14_spill] sm:$0xff] %v3441_v24  ;;  %v3456_v62 = vpack.c.bf16 %v1281_v10, %v1274_v56  ;;  %v3463_v1 = vpack.c.bf16 %v1100_v55, %v1097_v41  ;;  %v1175_v15 = vsub.f32 %v3414_v38, %v3956_v53  ;;  %v1295_v56 = vand.u32 4294901760, %v1294_v21  ;;  %v3480_v53 = vld [vmem:[#allocation5 + $0x148] sm:$0xff] }
  0x8f   :  { %4059 = vst [vmem:[#allocation15_spill] sm:$0xff] %v3447_v45  ;;  %v3472_v27 = vpack.c.bf16 %v1169_v9, %v1162_v47  ;;  %v3474_v12 = vsub.f32 %v95_v6, %v1100_v55  ;;  %v1288_v41 = vand.u32 4294901760, %v1287_v30  ;;  %v1103_v10 = vand.u32 4294901760, %v96_v59 }
  0x90   :  { %2579 = vmatpush3.bf16.msra.mxu0 %v3356_v28  ;;  %4060 = vst [vmem:[#allocation17_spill] sm:$0xff] %v3463_v1  ;;  %v1182_v28 = vsub.f32 %v3416_v52, %v3957_v11  ;;  %v3960_v11 = vand.u32 4294901760, %v3443_v0  ;;  %v1106_v47 = vand.u32 4294901760, %v97_v57  ;;  %v3964_v6 = vand.u32 4294901760, %v3445_v44 }
  0x91   :  { %2603 = vmatpush3.bf16.msra.mxu1 %v3017_v16  ;;  %2581 = vmatprep.subr.bf16.mxu0 %v3362_v58  ;;  %4061 = vst [vmem:[#allocation16_spill] sm:$0xff] %v3474_v12  ;;  %v3962_v16 = vand.u32 4294901760, %v3426_v50  ;;  %v3961_v58 = vand.u32 4294901760, %v3436_v26  ;;  %v3965_v55 = vand.u32 4294901760, %v3459_v61  ;;  %v3490_v9 = vsub.f32 %v78_v14, %v1049_v22 }
  0x92   :  { %2605 = vmatprep.subr.bf16.mxu1 %v3032_v49  ;;  %v3484_v49 = vpack.c.bf16 %v1052_v54, %v1049_v22  ;;  %v3492_v30 = vsub.f32 %v79_v20, %v1052_v54  ;;  %v1176_v21 = vand.u32 4294901760, %v1175_v15  ;;  %v1183_v3 = vand.u32 4294901760, %v1182_v28  ;;  %v98_v22 = vld [vmem:[#allocation5 + $0x1d0] sm:$0xff] }
  0x93   :  { %4063 = vst [vmem:[#allocation20_spill] sm:$0xff] %v3490_v9  ;;  %v1308_v43 = vsub.f32 %v3436_v26, %v3961_v58  ;;  %v3503_v14 = vpack.c.bf16 %v1295_v56, %v1288_v41  ;;  %v1189_v20 = vsub.f32 %v3443_v0, %v3960_v11  ;;  %v3511_v15 = vpack.c.bf16 %v1106_v47, %v1103_v10  ;;  %v99_v56 = vld [vmem:[#allocation5 + $0x1d8] sm:$0xff] }
  0x94   :  { %2583 = vmatpush3.bf16.msra.mxu0 %v3373_v7  ;;  %4062 = vst [vmem:[#allocation19_spill] sm:$0xff] %v3484_v49  ;;  %4064 = vst [vmem:[#allocation21_spill] sm:$0xff] %v3492_v30  ;;  %v1301_v7 = vsub.f32 %v3426_v50, %v3962_v16  ;;  %v3513_v28 = vsub.f32 %v96_v59, %v1103_v10  ;;  %v1196_v41 = vsub.f32 %v3445_v44, %v3964_v6  ;;  %v82_v16 = vld [vmem:[#allocation5 + $0x150] sm:$0xff]  ;;  %v83_v59 = vld [vmem:[#allocation5 + $0x158] sm:$0xff] }
  0x95   :  { %2607 = vmatpush3.bf16.msra.mxu1 %v3047_v4  ;;  %2585 = vmatprep.subr.bf16.mxu0 %v3379_v5  ;;  %v1055_v4 = vand.u32 4294901760, %v3478_v39  ;;  %v1058_v5 = vand.u32 4294901760, %v3480_v53  ;;  %4065 = vst [vmem:[#allocation22_spill] sm:$0xff] %v3511_v15  ;;  %v1129_v11 = vsub.f32 %v3459_v61, %v3965_v55  ;;  %v3523_v58 = vpack.c.bf16 %v1183_v3, %v1176_v21 }
  0x96   :  { %2609 = vmatprep.subr.bf16.mxu1 %v4033_v36  ;;  %v1302_v6 = vand.u32 4294901760, %v1301_v7  ;;  %v1309_v54 = vand.u32 4294901760, %v1308_v43  ;;  %v1109_v55 = vand.u32 4294901760, %v98_v22  ;;  %v1112_v3 = vand.u32 4294901760, %v99_v56 }
  0x97   :  { %v3530_v36 = vpack.c.bf16 %v1058_v5, %v1055_v4  ;;  %v4068_v21 = vand.u32 4294901760, %v3474_v12  ;;  %v1061_v43 = vand.u32 4294901760, %v82_v16  ;;  %v1064_v7 = vand.u32 4294901760, %v83_v59 }
  0x98   :  { %2587 = vmatpush3.bf16.msra.mxu0 %v3387_v19  ;;  %v3525_v19 = vsub.f32 %v97_v57, %v1106_v47  ;;  %v4067_v57 = vand.u32 4294901760, %v3447_v45  ;;  %v1130_v60 = vand.u32 4294901760, %v1129_v11  ;;  %v3552_v11 = vpack.c.bf16 %v1309_v54, %v1302_v6 }
  0x99   :  { %2611 = vmatpush3.bf16.msra.mxu1 %v4034_v25  ;;  %2621 = vmatprep.subr.bf16.mxu0 %v3389_v34  ;;  %4066 = vst [vmem:[#allocation23_spill] sm:$0xff] %v3530_v36  ;;  %v1190_v25 = vand.u32 4294901760, %v1189_v20  ;;  %v1322_v10 = vsub.f32 %v3474_v12, %v4068_v21  ;;  %v4069_v20 = vand.u32 4294901760, %v3490_v9  ;;  %v100_v12 = vld [vmem:[#allocation5 + $0x1e0] sm:$0xff] }
  0x9a   :  { %2613 = vmatprep.subr.bf16.mxu1 %v4035_v40  ;;  %v1315_v47 = vsub.f32 %v3447_v45, %v4067_v57  ;;  %v1197_v40 = vand.u32 4294901760, %v1196_v41  ;;  %v4070_v45 = vand.u32 4294901760, %v3492_v30 }
  0x9b   :  { %907 = vmatmul.mubr.f32.vlgmr.msra.gmra.mrb[8].mxu0 %v3154_v37  ;;  %v1203_v57 = vsub.f32 %v3490_v9, %v4069_v20  ;;  %v3560_v20 = vsub.f32 %v98_v22, %v1109_v55  ;;  %v1323_v41 = vand.u32 4294901760, %v1322_v10  ;;  %v84_v9 = vld [vmem:[#allocation5 + $0x160] sm:$0xff]  ;;  %v4072_v22 = vand.u32 4294901760, %v3513_v28 }
  0x9c   :  { %2623 = vmatpush3.bf16.msra.mxu0 %v3393_v13  ;;  %912 = vmatprep.mubr.f32.mxu0 %v3207_v33  ;;  %v1210_v21 = vsub.f32 %v3492_v30, %v4070_v45  ;;  %v101_v13 = vld [vmem:[#allocation5 + $0x1e8] sm:$0xff]  ;;  %v3563_v45 = vpack.c.bf16 %v1112_v3, %v1109_v55  ;;  %v3565_v30 = vsub.f32 %v99_v56, %v1112_v3  ;;  %v1316_v34 = vand.u32 4294901760, %v1315_v47  ;;  %v3584_v47 = vld [vmem:[#allocation5 + $0x1f0] sm:$0xff] }
  0x9d   :  { %2615 = vmatpush3.bf16.msra.mxu1 %v4037_v35  ;;  %2625 = vmatprep.subr.bf16.mxu0 %v3402_v8  ;;  %v3555_v35 = vsub.f32 %v3478_v39, %v1055_v4  ;;  %v3558_v8 = vsub.f32 %v3480_v53, %v1058_v5  ;;  %v3568_v6 = vpack.c.bf16 %v1197_v40, %v1190_v25  ;;  %v1115_v53 = vand.u32 4294901760, %v100_v12 }
  0x9e   :  { %2617 = vmatprep.subr.bf16.mxu1 %v4038_v63  ;;  %4071 = vst [vmem:[#allocation24_spill] sm:$0xff] %v3563_v45  ;;  %v85_v63 = vld [vmem:[#allocation5 + $0x168] sm:$0xff]  ;;  %v3570_v39 = vpack.c.bf16 %v1064_v7, %v1061_v43  ;;  %v1118_v4 = vand.u32 4294901760, %v101_v13  ;;  %v1204_v55 = vand.u32 4294901760, %v1203_v57  ;;  %v1211_v5 = vand.u32 4294901760, %v1210_v21  ;;  %v111_v21 = vld [vmem:[#allocation2 + $0x38] sm:$0xff] }
  0x9f   :  { %914 = vmatmul.mubr.f32.gmra.mrb[10].mxu0 %v3216_v29  ;;  %v1329_v54 = vsub.f32 %v3513_v28, %v4072_v22  ;;  %v4073_v56 = vand.u32 4294901760, %v3525_v19  ;;  %v3581_v25 = vsub.f32 %v82_v16, %v1061_v43  ;;  %v1067_v3 = vand.u32 4294901760, %v84_v9  ;;  %v3591_v22 = vld [vmem:[#allocation5 + $0x1f8] sm:$0xff] }
  0xa0   :  { %2627 = vmatpush3.bf16.msra.mxu0 %v3412_v23  ;;  %1131 = vmatprep.mubr.f32.mxu0 %v1130_v60  ;;  %v1070_v60 = vand.u32 4294901760, %v85_v63  ;;  %v3586_v40 = vpack.c.bf16 %v1323_v41, %v1316_v34  ;;  %v3588_v57 = vsub.f32 %v83_v59, %v1064_v7  ;;  %v3598_v16 = vsub.f32 %v100_v12, %v1115_v53  ;;  %v106_v59 = vld [vmem:[#allocation2 + $0x10] sm:$0xff] }
  0xa1   :  { %2619 = vmatpush3.bf16.msra.mxu1 %v4040_v17  ;;  %2629 = vmatprep.subr.bf16.mxu0 %v3431_v31  ;;  %v1336_v10 = vsub.f32 %v3525_v19, %v4073_v56  ;;  %v3980_v17 = vand.u32 4294901760, %v3555_v35  ;;  %v3600_v43 = vsub.f32 %v101_v13, %v1118_v4  ;;  %v3985_v34 = vand.u32 4294901760, %v3565_v30 }
  0xa2   :  { %2653 = vmatprep.subr.bf16.mxu1 %v3456_v62  ;;  %v3596_v62 = vpack.c.bf16 %v1118_v4, %v1115_v53  ;;  %4074 = vst [vmem:[#allocation25_spill] sm:$0xff] %v3598_v16  ;;  %v3605_v7 = vpack.c.bf16 %v1211_v5, %v1204_v55  ;;  %v1330_v41 = vand.u32 4294901760, %v1329_v54  ;;  %v3610_v13 = vpack.c.bf16 %v1070_v60, %v1067_v3  ;;  %v3618_v53 = vld [vmem:[#allocation5 + $0x170] sm:$0xff]  ;;  %v3620_v4 = vld [vmem:[#allocation5 + $0x178] sm:$0xff] }
  0xa3   :  { %v1337_v56 = vand.u32 4294901760, %v1336_v10  ;;  %v3612_v12 = vsub.f32 %v84_v9, %v1067_v3  ;;  %v3622_v55 = vsub.f32 %v85_v63, %v1070_v60  ;;  %v4075_v5 = vand.u32 4294901760, %v3558_v8 }
  0xa4   :  { %1018 = vmatmul.mubr.f32.vlgmr.msra.gmra.mrb[8].mxu1 %v3154_v37  ;;  %2631 = vmatpush3.bf16.msra.mxu0 %v3441_v24  ;;  %v1121_v37 = vand.u32 4294901760, %v3584_v47  ;;  %v4076_v54 = vand.u32 4294901760, %v3560_v20  ;;  %v3630_v10 = vand.u32 4294901760, %v106_v59  ;;  %v1350_v3 = vsub.f32 %v3565_v30, %v3985_v34 }
  0xa5   :  { %2655 = vmatpush3.bf16.msra.mxu1 %v3472_v27  ;;  %1023 = vmatprep.mubr.f32.mxu1 %v3207_v33  ;;  %v1217_v27 = vsub.f32 %v3555_v35, %v3980_v17  ;;  %v1124_v33 = vand.u32 4294901760, %v3591_v22  ;;  %v3639_v17 = vand.u32 4294901760, %v111_v21  ;;  %v4078_v63 = vand.u32 4294901760, %v3588_v57 }
  0xa6   :  { %2633 = vmatprep.subr.bf16.mxu0 %v3463_v1  ;;  %2657 = vmatprep.subr.bf16.mxu1 %v3503_v14  ;;  %v1224_v14 = vsub.f32 %v3558_v8, %v4075_v5  ;;  %v1343_v9 = vsub.f32 %v3560_v20, %v4076_v54  ;;  %v110_v5 = vld [vmem:[#allocation2 + $0x30] sm:$0xff]  ;;  %v2668_v54 = vpack.c.bf16 %v1337_v56, %v1330_v41  ;;  %v1076_v1 = vand.u32 4294901760, %v3620_v4 }
  0xa7   :  { %v1218_v34 = vand.u32 4294901760, %v1217_v27  ;;  %v3650_v60 = vsub.f32 %v3591_v22, %v1124_v33  ;;  %v4077_v27 = vand.u32 4294901760, %v3581_v25 }
  0xa8   :  { %1025 = vmatmul.mubr.f32.gmra.mrb[10].mxu1 %v3216_v29  ;;  %2635 = vmatpush3.bf16.msra.mxu0 %v3484_v49  ;;  %v3644_v29 = vsub.f32 %v3584_v47, %v1121_v37  ;;  %v1073_v49 = vand.u32 4294901760, %v3618_v53  ;;  %v1225_v56 = vand.u32 4294901760, %v1224_v14  ;;  %v1344_v41 = vand.u32 4294901760, %v1343_v9 }
  0xa9   :  { %2659 = vmatpush3.bf16.msra.mxu1 %v3523_v58  ;;  %2637 = vmatprep.subr.bf16.mxu0 %v3511_v15  ;;  %v3656_v47 = vsub.f32 %v106_v59, %v3630_v10  ;;  %v3658_v15 = vand.u32 4294901760, %v110_v5  ;;  %v1231_v22 = vsub.f32 %v3581_v25, %v4077_v27  ;;  %v1238_v58 = vsub.f32 %v3588_v57, %v4078_v63 }
  0xaa   :  { %2661 = vmatprep.subr.bf16.mxu1 %v3552_v11  ;;  %1382 = vmatprep.mubr.f32.mxu1 %v3433_v2  ;;  %v1351_v11 = vand.u32 4294901760, %v1350_v3  ;;  %v3668_v2 = vsub.f32 %v111_v21, %v3639_v17  ;;  %v3673_v59 = vsub.f32 %v3618_v53, %v1073_v49  ;;  %v3676_v14 = vsub.f32 %v3620_v4, %v1076_v1 }
  0xab   :  { %v4079_v63 = vand.u32 4294901760, %v3598_v16  ;;  %v3999_v53 = vand.u32 4294901760, %v3644_v29  ;;  %v2670_v4 = vpack.c.bf16 %v1225_v56, %v1218_v34  ;;  %v4000_v9 = vand.u32 4294901760, %v3656_v47 }
  0xac   :  { %2639 = vmatpush3.bf16.msra.mxu0 %v3530_v36  ;;  %v3689_v36 = vpack.c.bf16 %v1124_v33, %v1121_v37  ;;  %v3693_v3 = vsub.f32 %v110_v5, %v3658_v15  ;;  %v4001_v24 = vand.u32 4294901760, %v3668_v2  ;;  %v4081_v34 = vand.u32 4294901760, %v3612_v12 }
  0xad   :  { %2663 = vmatpush3.bf16.msra.mxu1 %v3568_v6  ;;  %2641 = vmatprep.subr.bf16.mxu0 %v3563_v45  ;;  %v1357_v21 = vsub.f32 %v3598_v16, %v4079_v63  ;;  %v4080_v6 = vand.u32 4294901760, %v3600_v43  ;;  %v3998_v45 = vand.u32 4294901760, %v3650_v60  ;;  %v1232_v63 = vand.u32 4294901760, %v1231_v22 }
  0xae   :  { %2665 = vmatprep.subr.bf16.mxu1 %v3586_v40  ;;  %v2672_v40 = vpack.c.bf16 %v1351_v11, %v1344_v41  ;;  %v1239_v16 = vand.u32 4294901760, %v1238_v58  ;;  %v1245_v37 = vsub.f32 %v3612_v12, %v4081_v34  ;;  %v4082_v33 = vand.u32 4294901760, %v3622_v55 }
  0xaf   :  { %v1364_v27 = vsub.f32 %v3600_v43, %v4080_v6  ;;  %v4002_v56 = vand.u32 4294901760, %v3673_v59  ;;  %v4003_v41 = vand.u32 4294901760, %v3676_v14  ;;  %v1358_v58 = vand.u32 4294901760, %v1357_v21 }
  0xb0   :  { %2643 = vmatpush3.bf16.msra.mxu0 %v3570_v39  ;;  %v1252_v5 = vsub.f32 %v3622_v55, %v4082_v33  ;;  %v1378_v22 = vsub.f32 %v3650_v60, %v3998_v45  ;;  %v1135_v6 = vsub.f32 %v3656_v47, %v4000_v9  ;;  %v3718_v33 = vpack.c.bf16 %v1076_v1, %v1073_v49 }
  0xb1   :  { %2667 = vmatpush3.bf16.msra.mxu1 %v3605_v7  ;;  %2645 = vmatprep.subr.bf16.mxu0 %v3596_v62  ;;  %v1365_v11 = vand.u32 4294901760, %v1364_v27  ;;  %v1371_v7 = vsub.f32 %v3644_v29, %v3999_v53  ;;  %v2684_v21 = vpack.c.bf16 %v3336_v18, %v3334_v32  ;;  %v1144_v27 = vsub.f32 %v3668_v2, %v4001_v24 }
  0xb2   :  { %2669 = vmatprep.subr.bf16.mxu1 %v2668_v54  ;;  %v2674_v54 = vpack.c.bf16 %v1239_v16, %v1232_v63  ;;  %v1246_v45 = vand.u32 4294901760, %v1245_v37  ;;  %v1253_v53 = vand.u32 4294901760, %v1252_v5  ;;  %v1259_v9 = vsub.f32 %v3673_v59, %v4002_v56 }
  0xb3   :  { %v1266_v1 = vsub.f32 %v3676_v14, %v4003_v41  ;;  %v2676_v49 = vpack.c.bf16 %v1365_v11, %v1358_v58  ;;  %v1372_v16 = vand.u32 4294901760, %v1371_v7  ;;  %v1379_v63 = vand.u32 4294901760, %v1378_v22 }
  0xb4   :  { %2647 = vmatpush3.bf16.msra.mxu0 %v3610_v13  ;;  %v1136_v34 = vand.u32 4294901760, %v1135_v6  ;;  %v4083_v24 = vand.u32 4294901760, %v3693_v3  ;;  %v2686_v37 = vpack.c.bf16 %v3343_v42, %v3341_v48  ;;  %v1145_v5 = vand.u32 4294901760, %v1144_v27  ;;  %v4088_v27 = vld [vmem:[#allocation21_spill] sm:$0xff] }
  0xb5   :  { %2671 = vmatpush3.bf16.msra.mxu1 %v2670_v4  ;;  %2649 = vmatprep.subr.bf16.mxu0 %v3689_v36  ;;  %v2678_v56 = vpack.c.bf16 %v1253_v53, %v1246_v45  ;;  %v1260_v58 = vand.u32 4294901760, %v1259_v9  ;;  %v1267_v11 = vand.u32 4294901760, %v1266_v1  ;;  %v2680_v7 = vpack.c.bf16 %v1379_v63, %v1372_v16  ;;  %v4084_v53 = vld [vmem:[#allocation11_spill] sm:$0xff]  ;;  %v4090_v63 = vld [vmem:[#allocation13_spill] sm:$0xff] }
  0xb6   :  { %2673 = vmatprep.subr.bf16.mxu1 %v2672_v40  ;;  %v1150_v4 = vsub.f32 %v3693_v3, %v4083_v24  ;;  %v2688_v40 = vpack.c.bf16 %v3397_v51, %v3395_v46  ;;  %v2690_v24 = vpack.c.bf16 %v3416_v52, %v3414_v38  ;;  %v2692_v45 = vpack.c.bf16 %v3436_v26, %v3426_v50 }
  0xb7   :  { %v2682_v6 = vpack.c.bf16 %v1267_v11, %v1260_v58  ;;  %v2694_v9 = vpack.c.bf16 %v3445_v44, %v3443_v0  ;;  %v2700_v16 = vpack.c.bf16 %v3525_v19, %v3513_v28  ;;  %v4092_v58 = vld [vmem:[#allocation14_spill] sm:$0xff]  ;;  %v4093_v11 = vld [vmem:[#allocation25_spill] sm:$0xff] }
  0xb8   :  { %2651 = vmatpush3.bf16.msra.mxu0 %v3718_v33  ;;  %v1151_v22 = vand.u32 4294901760, %v1150_v4  ;;  %v2702_v4 = vpack.c.bf16 %v3558_v8, %v3555_v35 }
  0xb9   :  { %2675 = vmatpush3.bf16.msra.mxu1 %v2674_v54  ;;  %2685 = vmatprep.subr.bf16.mxu0 %v2684_v21  ;;  %v4086_v54 = vld [vmem:[#allocation16_spill] sm:$0xff] }
  0xba   :  { %2677 = vmatprep.subr.bf16.mxu1 %v2676_v49  ;;  %v4087_v21 = vld [vmem:[#allocation20_spill] sm:$0xff] }
  0xbb   :  { %1137 = vmatmul.mubr.f32.vlgmr.msra.gmra.mrb[12].mxu0 %v1136_v34  ;;  %v4085_v34 = vld [vmem:[#allocation15_spill] sm:$0xff]  ;;  %v2698_v1 = vpack.c.bf16 %v4088_v27, %v4087_v21  ;;  %v4089_v49 = vld [vmem:[#allocation12_spill] sm:$0xff] }
  0xbc   :  { %2687 = vmatpush3.bf16.msra.mxu0 %v2686_v37  ;;  %1146 = vmatprep.mubr.f32.mxu0 %v1145_v5  ;;  %v2704_v37 = vpack.c.bf16 %v3565_v30, %v3560_v20  ;;  %v4091_v5 = vand.u32 4294901760, %v3459_v61 }
  0xbd   :  { %2679 = vmatpush3.bf16.msra.mxu1 %v2678_v56  ;;  %2689 = vmatprep.subr.bf16.mxu0 %v2688_v40  ;;  %v2696_v56 = vpack.c.bf16 %v4086_v54, %v4085_v34  ;;  %v2706_v40 = vpack.c.bf16 %v3588_v57, %v3581_v25 }
  0xbe   :  { %2681 = vmatprep.subr.bf16.mxu1 %v2680_v7  ;;  %v2708_v7 = vpack.c.bf16 %v3600_v43, %v4093_v11 }
  0xbf   :  { %1152 = vmatmul.mubr.f32.gmra.mrb[14].mxu0 %v1151_v22  ;;  %v4094_v22 = vld [vmem:[#allocation17_spill] sm:$0xff] }
  0xc0   :  { %2691 = vmatpush3.bf16.msra.mxu0 %v2690_v24  ;;  %1526 = vmatprep.mubr.f32.mxu0 %v3459_v61  ;;  %v2710_v24 = vpack.c.bf16 %v3622_v55, %v3612_v12  ;;  %v2712_v61 = vpack.c.bf16 %v3650_v60, %v3644_v29 }
  0xc1   :  { %2683 = vmatpush3.bf16.msra.mxu1 %v2682_v6  ;;  %2693 = vmatprep.subr.bf16.mxu0 %v2692_v45  ;;  %v4095_v6 = vld [vmem:[#allocation19_spill] sm:$0xff]  ;;  %v4096_v45 = vld [vmem:[#allocation22_spill] sm:$0xff] }
  0xc2   :  { %2717 = vmatprep.subr.bf16.mxu1 %v4084_v53 }
  0xc4   :  { %1384 = vmatmul.mubr.f32.vlgmr.msra.gmra.mrb[12].mxu1 %v3630_v10  ;;  %2695 = vmatpush3.bf16.msra.mxu0 %v2694_v9  ;;  %v2714_v9 = vpack.c.bf16 %v3676_v14, %v3673_v59 }
  0xc5   :  { %2719 = vmatpush3.bf16.msra.mxu1 %v4089_v49  ;;  %1389 = vmatprep.mubr.f32.mxu1 %v3639_v17 }
  0xc6   :  { %2697 = vmatprep.subr.bf16.mxu0 %v2696_v56  ;;  %2721 = vmatprep.subr.bf16.mxu1 %v4090_v63  ;;  %v4097_v56 = vld [vmem:[#allocation23_spill] sm:$0xff] }
  0xc8   :  { %1391 = vmatmul.mubr.f32.gmra.mrb[14].mxu1 %v3658_v15  ;;  %2699 = vmatpush3.bf16.msra.mxu0 %v2698_v1  ;;  %v4098_v1 = vand.u32 4294901760, %v3334_v32  ;;  %v4105_v32 = vand.u32 4294901760, %v3414_v38  ;;  %v4110_v38 = vand.u32 4294901760, %v3445_v44  ;;  %v4116_v44 = vand.u32 4294901760, %v4088_v27 }
  0xc9   :  { %2723 = vmatpush3.bf16.msra.mxu1 %v3412_v23  ;;  %2701 = vmatprep.subr.bf16.mxu0 %v2700_v16  ;;  %v4099_v16 = vand.u32 4294901760, %v3336_v18  ;;  %v4106_v18 = vand.u32 4294901760, %v3416_v52  ;;  %v4111_v52 = vld [vmem:[#allocation18_spill] sm:$0xff]  ;;  %v4122_v27 = vand.u32 4294901760, %v3558_v8  ;;  %v4127_v8 = vand.u32 4294901760, %v4093_v11 }
  0xca   :  { %2725 = vmatprep.subr.bf16.mxu1 %v3431_v31  ;;  %1642 = vmatprep.mubr.f32.mxu1 %v4091_v5  ;;  %v4101_v5 = vand.u32 4294901760, %v3341_v48  ;;  %v4134_v11 = vand.u32 4294901760, %v3676_v14 }
  0xcb   :  { %v2754_v48 = vpack.c.bf16 %v4106_v18, %v4105_v32 }
  0xcc   :  { %2703 = vmatpush3.bf16.msra.mxu0 %v2702_v4  ;;  %v2748_v4 = vpack.c.bf16 %v4099_v16, %v4098_v1  ;;  %v4114_v16 = vand.u32 4294901760, %v3656_v47 }
  0xcd   :  { %2727 = vmatpush3.bf16.msra.mxu1 %v4092_v58  ;;  %2705 = vmatprep.subr.bf16.mxu0 %v2704_v37  ;;  %v4100_v37 = vld [vmem:[#allocation24_spill] sm:$0xff] }
  0xce   :  { %2729 = vmatprep.subr.bf16.mxu1 %v4094_v22 }
  0xd0   :  { %2707 = vmatpush3.bf16.msra.mxu0 %v2706_v40  ;;  %v4102_v40 = vand.u32 4294901760, %v3343_v42  ;;  %v4107_v42 = vand.u32 4294901760, %v3426_v50  ;;  %v4112_v50 = vand.u32 4294901760, %v4085_v34  ;;  %v4119_v34 = vand.u32 4294901760, %v3525_v19 }
  0xd1   :  { %2731 = vmatpush3.bf16.msra.mxu1 %v4095_v6  ;;  %2709 = vmatprep.subr.bf16.mxu0 %v2708_v7 }
  0xd2   :  { %2733 = vmatprep.subr.bf16.mxu1 %v4096_v45  ;;  %v2750_v7 = vpack.c.bf16 %v4102_v40, %v4101_v5  ;;  %v4117_v5 = vand.u32 4294901760, %v3668_v2 }
  0xd4   :  { %2711 = vmatpush3.bf16.msra.mxu0 %v2710_v24  ;;  %v4103_v24 = vand.u32 4294901760, %v3395_v46  ;;  %v4108_v46 = vand.u32 4294901760, %v3436_v26  ;;  %v4113_v26 = vand.u32 4294901760, %v4086_v54 }
  0xd5   :  { %2735 = vmatpush3.bf16.msra.mxu1 %v4097_v56  ;;  %2713 = vmatprep.subr.bf16.mxu0 %v2712_v61  ;;  %v4104_v61 = vand.u32 4294901760, %v3397_v51 }
  0xd6   :  { %2737 = vmatprep.subr.bf16.mxu1 %v4100_v37  ;;  %v2756_v51 = vpack.c.bf16 %v4108_v46, %v4107_v42 }
  0xd7   :  { %v2752_v41 = vpack.c.bf16 %v4104_v61, %v4103_v24 }
  0xd8   :  { %2715 = vmatpush3.bf16.msra.mxu0 %v2714_v9  ;;  %v4109_v9 = vand.u32 4294901760, %v3443_v0  ;;  %v4115_v0 = vand.u32 4294901760, %v4087_v21  ;;  %v4121_v21 = vand.u32 4294901760, %v3555_v35  ;;  %v4126_v35 = vand.u32 4294901760, %v3588_v57 }
  0xd9   :  { %2739 = vmatpush3.bf16.msra.mxu1 %v3570_v39  ;;  %2749 = vmatprep.subr.bf16.mxu0 %v2748_v4  ;;  %v4132_v57 = vand.u32 4294901760, %v3650_v60 }
  0xda   :  { %2741 = vmatprep.subr.bf16.mxu1 %v3596_v62  ;;  %v2758_v1 = vpack.c.bf16 %v4110_v38, %v4109_v9  ;;  %v2762_v4 = vpack.c.bf16 %v4116_v44, %v4115_v0 }
  0xdb   :  { %1529 = vmatmul.mubr.f32.vlgmr.msra.gmra.mrb[16].mxu0 %v3656_v47  ;;  %v4120_v47 = vand.u32 4294901760, %v3693_v3 }
  0xdc   :  { %2751 = vmatpush3.bf16.msra.mxu0 %v2750_v7  ;;  %1535 = vmatprep.mubr.f32.mxu0 %v3668_v2  ;;  %v4123_v2 = vand.u32 4294901760, %v3560_v20 }
  0xdd   :  { %2743 = vmatpush3.bf16.msra.mxu1 %v3610_v13  ;;  %2753 = vmatprep.subr.bf16.mxu0 %v2752_v41  ;;  %v2760_v41 = vpack.c.bf16 %v4113_v26, %v4112_v50 }
  0xde   :  { %2745 = vmatprep.subr.bf16.mxu1 %v3689_v36 }
  0xdf   :  { %1538 = vmatmul.mubr.f32.gmra.mrb[18].mxu0 %v3693_v3  ;;  %v4125_v3 = vand.u32 4294901760, %v3581_v25  ;;  %v4131_v25 = vand.u32 4294901760, %v3644_v29 }
  0xe0   :  { %2755 = vmatpush3.bf16.msra.mxu0 %v2754_v48  ;;  %1823 = vmatprep.mubr.f32.mxu0 %v4111_v52 }
  0xe1   :  { %2747 = vmatpush3.bf16.msra.mxu1 %v3718_v33  ;;  %2757 = vmatprep.subr.bf16.mxu0 %v2756_v51 }
  0xe2   :  { %2781 = vmatprep.subr.bf16.mxu1 %v4084_v53  ;;  %v4118_v53 = vand.u32 4294901760, %v3513_v28  ;;  %v4124_v28 = vand.u32 4294901760, %v3565_v30  ;;  %v4130_v30 = vand.u32 4294901760, %v3622_v55 }
  0xe4   :  { %1646 = vmatmul.mubr.f32.vlgmr.msra.gmra.mrb[16].mxu1 %v4114_v16  ;;  %2759 = vmatpush3.bf16.msra.mxu0 %v2758_v1  ;;  %v2764_v54 = vpack.c.bf16 %v4119_v34, %v4118_v53  ;;  %v2768_v19 = vpack.c.bf16 %v4124_v28, %v4123_v2 }
  0xe5   :  { %2783 = vmatpush3.bf16.msra.mxu1 %v4089_v49  ;;  %1653 = vmatprep.mubr.f32.mxu1 %v4117_v5  ;;  %v2766_v49 = vpack.c.bf16 %v4122_v27, %v4121_v21 }
  0xe6   :  { %2761 = vmatprep.subr.bf16.mxu0 %v2760_v41  ;;  %2785 = vmatprep.subr.bf16.mxu1 %v4090_v63  ;;  %v2770_v63 = vpack.c.bf16 %v4126_v35, %v4125_v3 }
  0xe8   :  { %1657 = vmatmul.mubr.f32.gmra.mrb[18].mxu1 %v4120_v47  ;;  %2763 = vmatpush3.bf16.msra.mxu0 %v2762_v4 }
  0xe9   :  { %2787 = vmatpush3.bf16.msra.mxu1 %v3412_v23  ;;  %2765 = vmatprep.subr.bf16.mxu0 %v2764_v54  ;;  %v4128_v23 = vand.u32 4294901760, %v3600_v43  ;;  %v4133_v43 = vand.u32 4294901760, %v3673_v59 }
  0xea   :  { %2789 = vmatprep.subr.bf16.mxu1 %v3431_v31  ;;  %1934 = vmatprep.mubr.f32.mxu1 %v4111_v52  ;;  %v4129_v31 = vand.u32 4294901760, %v3612_v12  ;;  %v2898_v52 = vmov 0.0  }
  0xeb   :  { %v2772_v20 = vpack.c.bf16 %v4128_v23, %v4127_v8  ;;  %1948 = vst [vmem:[#allocation7] sm:$0xf] %v2898_v52  ;;  %1949 = vst [vmem:[#allocation7 + $0x10] sm:$0xf] %v2898_v52 }
  0xec   :  { %2767 = vmatpush3.bf16.msra.mxu0 %v2766_v49  ;;  %v2774_v40 = vpack.c.bf16 %v4130_v30, %v4129_v31  ;;  %1950 = vst [vmem:[#allocation7 + $0xc] sm:$0xf] %v2898_v52  ;;  %1951 = vst [vmem:[#allocation7 + $0x1c] sm:$0xf] %v2898_v52 }
  0xed   :  { %2791 = vmatpush3.bf16.msra.mxu1 %v4092_v58  ;;  %2769 = vmatprep.subr.bf16.mxu0 %v2768_v19  ;;  %v2776_v58 = vpack.c.bf16 %v4132_v57, %v4131_v25 }
  0xee   :  { %2793 = vmatprep.subr.bf16.mxu1 %v4094_v22  ;;  %v2778_v22 = vpack.c.bf16 %v4134_v11, %v4133_v43 }
  0xf0   :  { %2771 = vmatpush3.bf16.msra.mxu0 %v2770_v63 }
  0xf1   :  { %2795 = vmatpush3.bf16.msra.mxu1 %v4095_v6  ;;  %2773 = vmatprep.subr.bf16.mxu0 %v2772_v20 }
  0xf2   :  { %2797 = vmatprep.subr.bf16.mxu1 %v4096_v45 }
  0xf4   :  { %2775 = vmatpush3.bf16.msra.mxu0 %v2774_v40 }
  0xf5   :  { %2799 = vmatpush3.bf16.msra.mxu1 %v4097_v56  ;;  %2777 = vmatprep.subr.bf16.mxu0 %v2776_v58 }
  0xf6   :  { %2801 = vmatprep.subr.bf16.mxu1 %v4100_v37 }
  0xf8   :  { %2779 = vmatpush3.bf16.msra.mxu0 %v2778_v22 }
  0xf9   :  { %2803 = vmatpush3.bf16.msra.mxu1 %v3570_v39 }
  0xfa   :  { %2805 = vmatprep.subr.bf16.mxu1 %v3596_v62 }
  0xfb   :  { %1825 = vmatmul.mubr.f32.vlgmr.msra.gmra.mrb[20].mxu0 %v3630_v10 }
  0xfc   :  { %1830 = vmatprep.mubr.f32.mxu0 %v3639_v17 }
  0xfd   :  { %2807 = vmatpush3.bf16.msra.mxu1 %v3610_v13 }
  0xfe   :  { %2809 = vmatprep.subr.bf16.mxu1 %v3689_v36 }
  0xff   :  { %1832 = vmatmul.mubr.f32.gmra.mrb[22].mxu0 %v3658_v15 }
 0x101   :  { %2811 = vmatpush3.bf16.msra.mxu1 %v3718_v33 }
 0x104   :  { %1936 = vmatmul.mubr.f32.vlgmr.msra.gmra.mrb[20].mxu1 %v3630_v10 }
 0x105   :  { %1941 = vmatprep.mubr.f32.mxu1 %v3639_v17 }
 0x108   :  { %1943 = vmatmul.mubr.f32.gmra.mrb[22].mxu1 %v3658_v15 }
 0x12e   :  { %v2004_v39 = vpop.f32.mrb[0].mxu0 }
 0x12f   :  { %v2005_v62 = vpop.f32.mrb[1].mxu0 }
 0x130   :  { %v2006_v12 = vadd.f32 %v2005_v62, %v2004_v39 }
 0x137   :  { %v2042_v55 = vpop.f32.mrb[0].mxu1 }
 0x138   :  { %v2043_v60 = vpop.f32.mrb[1].mxu1 }
 0x139   :  { %v2044_v29 = vadd.f32 %v2043_v60, %v2042_v55 }
 0x13b   :  { %v468_v59 = vadd.f32 %v2044_v29, %v2006_v12  ;;  %v2045_v13 = vpop.f32.mrb[2].mxu1 }
 0x13c   :  { %v2046_v14 = vpop.f32.mrb[3].mxu1 }
 0x13d   :  { %v2007_v36 = vpop.f32.mrb[2].mxu0  ;;  %v2047_v6 = vadd.f32 %v2046_v14, %v2045_v13 }
 0x13e   :  { %v2008_v45 = vpop.f32.mrb[3].mxu0 }
 0x13f   :  { %v2009_v56 = vadd.f32 %v2008_v45, %v2007_v36 }
 0x141   :  { %v475_v33 = vadd.f32 %v2047_v6, %v2009_v56 }
 0x14e   :  { %v2080_v37 = vpop.f32.mrb[4].mxu0 }
 0x14f   :  { %v2081_v10 = vpop.f32.mrb[5].mxu0 }
 0x150   :  { %v2082_v7 = vadd.f32 %v2081_v10, %v2080_v37 }
 0x152   :  { %v613_v17 = vadd.f32 %v2082_v7, %v468_v59  ;;  %v2083_v24 = vpop.f32.mrb[6].mxu0 }
 0x153   :  { %v2084_v15 = vpop.f32.mrb[7].mxu0 }
 0x154   :  { %v2085_v61 = vadd.f32 %v2084_v15, %v2083_v24 }
 0x156   :  { %v622_v32 = vadd.f32 %v2085_v61, %v475_v33 }
 0x157   :  { %v2118_v18 = vpop.f32.mrb[4].mxu1 }
 0x158   :  { %v2119_v48 = vpop.f32.mrb[5].mxu1 }
 0x159   :  { %v2120_v42 = vadd.f32 %v2119_v48, %v2118_v18 }
 0x15b   :  { %v730_v46 = vadd.f32 %v2120_v42, %v613_v17  ;;  %v2121_v51 = vpop.f32.mrb[6].mxu1 }
 0x15c   :  { %v2122_v9 = vpop.f32.mrb[7].mxu1 }
 0x15d   :  { %v2123_v38 = vadd.f32 %v2122_v9, %v2121_v51 }
 0x15f   :  { %v741_v1 = vadd.f32 %v2123_v38, %v622_v32 }
 0x16e   :  { %v2156_v50 = vpop.f32.mrb[8].mxu0 }
 0x16f   :  { %v2157_v26 = vpop.f32.mrb[9].mxu0 }
 0x170   :  { %v2158_v41 = vadd.f32 %v2157_v26, %v2156_v50 }
 0x172   :  { %v909_v16 = vadd.f32 %v2158_v41, %v730_v46  ;;  %v2159_v0 = vpop.f32.mrb[10].mxu0 }
 0x173   :  { %v2160_v44 = vpop.f32.mrb[11].mxu0 }
 0x174   :  { %v2161_v4 = vadd.f32 %v2160_v44, %v2159_v0 }
 0x176   :  { %v916_v5 = vadd.f32 %v2161_v4, %v741_v1 }
 0x177   :  { %v2194_v53 = vpop.f32.mrb[8].mxu1 }
 0x178   :  { %v2195_v34 = vpop.f32.mrb[9].mxu1 }
 0x179   :  { %v2196_v54 = vadd.f32 %v2195_v34, %v2194_v53 }
 0x17b   :  { %v1020_v47 = vadd.f32 %v2196_v54, %v909_v16  ;;  %v2197_v21 = vpop.f32.mrb[10].mxu1 }
 0x17c   :  { %v2198_v27 = vpop.f32.mrb[11].mxu1 }
 0x17d   :  { %v2199_v49 = vadd.f32 %v2198_v27, %v2197_v21 }
 0x17f   :  { %v1027_v2 = vadd.f32 %v2199_v49, %v916_v5 }
 0x18e   :  { %v2232_v28 = vpop.f32.mrb[12].mxu0 }
 0x18f   :  { %v2233_v19 = vpop.f32.mrb[13].mxu0 }
 0x190   :  { %v2234_v3 = vadd.f32 %v2233_v19, %v2232_v28 }
 0x192   :  { %v1139_v35 = vadd.f32 %v2234_v3, %v1020_v47  ;;  %v2235_v63 = vpop.f32.mrb[14].mxu0 }
 0x193   :  { %v2236_v8 = vpop.f32.mrb[15].mxu0 }
 0x194   :  { %v2237_v23 = vadd.f32 %v2236_v8, %v2235_v63 }
 0x196   :  { %v1154_v20 = vadd.f32 %v2237_v23, %v1027_v2 }
 0x197   :  { %v2270_v31 = vpop.f32.mrb[12].mxu1 }
 0x198   :  { %v2271_v30 = vpop.f32.mrb[13].mxu1 }
 0x199   :  { %v2272_v40 = vadd.f32 %v2271_v30, %v2270_v31 }
 0x19b   :  { %v1386_v25 = vadd.f32 %v2272_v40, %v1139_v35  ;;  %v2273_v57 = vpop.f32.mrb[14].mxu1 }
 0x19c   :  { %v2274_v58 = vpop.f32.mrb[15].mxu1 }
 0x19d   :  { %v2275_v43 = vadd.f32 %v2274_v58, %v2273_v57 }
 0x19f   :  { %v1393_v11 = vadd.f32 %v2275_v43, %v1154_v20 }
 0x1ae   :  { %v2308_v22 = vpop.f32.mrb[16].mxu0 }
 0x1af   :  { %v2309_v39 = vpop.f32.mrb[17].mxu0 }
 0x1b0   :  { %v2310_v62 = vadd.f32 %v2309_v39, %v2308_v22 }
 0x1b2   :  { %v1531_v12 = vadd.f32 %v2310_v62, %v1386_v25  ;;  %v2311_v55 = vpop.f32.mrb[18].mxu0 }
 0x1b3   :  { %v2312_v60 = vpop.f32.mrb[19].mxu0 }
 0x1b4   :  { %v2313_v29 = vadd.f32 %v2312_v60, %v2311_v55 }
 0x1b6   :  { %v1540_v59 = vadd.f32 %v2313_v29, %v1393_v11 }
 0x1b7   :  { %v2346_v13 = vpop.f32.mrb[16].mxu1 }
 0x1b8   :  { %v2347_v14 = vpop.f32.mrb[17].mxu1 }
 0x1b9   :  { %v2348_v36 = vadd.f32 %v2347_v14, %v2346_v13 }
 0x1bb   :  { %v1648_v6 = vadd.f32 %v2348_v36, %v1531_v12  ;;  %v2349_v45 = vpop.f32.mrb[18].mxu1 }
 0x1bc   :  { %v2350_v56 = vpop.f32.mrb[19].mxu1 }
 0x1bd   :  { %v2351_v33 = vadd.f32 %v2350_v56, %v2349_v45 }
 0x1bf   :  { %v1659_v37 = vadd.f32 %v2351_v33, %v1540_v59 }
 0x1ce   :  { %v2384_v10 = vpop.f32.mrb[20].mxu0 }
 0x1cf   :  { %v2385_v7 = vpop.f32.mrb[21].mxu0 }
 0x1d0   :  { %v2386_v17 = vadd.f32 %v2385_v7, %v2384_v10 }
 0x1d2   :  { %v1827_v24 = vadd.f32 %v2386_v17, %v1648_v6  ;;  %v2387_v15 = vpop.f32.mrb[22].mxu0 }
 0x1d3   :  { %v2388_v61 = vpop.f32.mrb[23].mxu0 }
 0x1d4   :  { %v2389_v32 = vadd.f32 %v2388_v61, %v2387_v15 }
 0x1d6   :  { %v1834_v18 = vadd.f32 %v2389_v32, %v1659_v37 }
 0x1d7   :  { %v2422_v48 = vpop.f32.mrb[20].mxu1 }
 0x1d8   :  { %v2423_v42 = vpop.f32.mrb[21].mxu1 }
 0x1d9   :  { %v2424_v46 = vadd.f32 %v2423_v42, %v2422_v48 }
 0x1db   :  { %v1938_v51 = vadd.f32 %v2424_v46, %v1827_v24  ;;  %v2425_v9 = vpop.f32.mrb[22].mxu1 }
 0x1dc   :  { %v2426_v38 = vpop.f32.mrb[23].mxu1 }
 0x1dd   :  { %1952 = vst [vmem:[#allocation7 + $0x4] sm:$0xff] %v1938_v51  ;;  %v2427_v1 = vadd.f32 %v2426_v38, %v2425_v9 }
 0x1df   :  { %v1945_v52 = vadd.f32 %v2427_v1, %v1834_v18 }
 0x1e1   :  { %1953 = vst [vmem:[#allocation7 + $0x14] sm:$0xff] %v1945_v52 }
 0x1e2   :  { %2875 = shalt.err (!%p2872_p6)
}
 0x1e3   :  { %s2876_s12 = scalar_lea.hbm %s3902_s2, 512 }
 0x1e4   :  { %p2877_p7 = scmp.ne.s32.totalorder %s3902_s2, %s2876_s12  ;;  %p2880_p8 = scmp.lt.u32.totalorder %s2876_s12, %s3902_s2 }
 0x1e6   :  { %p2882_p9 = pnand %p2880_p8, %p2877_p7 }
 0x1e8   :  { %2885 = shalt.err (!%p2882_p9)
}
 0x1e9   :  { %1965 = dma.vmem_to_hbm [thread:$0]  %s1960_s8, 512, %s3902_s2, [#allocation4], %s2896_s0, %s2896_s0, %s2897_s5  }
 0x1ea   :  { %2890 = dma.done.wait [#allocation4], 512  }
 0x1eb   :  { %2891 = vsyncadd [#allocation4], 4294966784 }
 0x1ec   :  { %1969 = vsyncpa [#allocation3], 1 }
 0x1ed   :  { %1970 = vsyncpa [#allocation6], 1 }
 0x1ee   :  { %1971 = vsyncpa [#allocation4], 1 }

</bundles_post_ra>
